<compile_context>
chip_gen: v7x
topology: tpu7x:2x2x1
jax: 0.10.0
libtpu: 0.0.40
codegen_flags: <defaults>
</compile_context>

<pallas_src>
import functools

import jax
import jax.numpy as jnp
from jax.experimental import pallas as pl
from jax.experimental.pallas import tpu as pltpu

ND = 512          # hidden size from the module (nd = 512)
LN_EPS = 1e-5     # PyTorch nn.LayerNorm default eps
NEG_SLOPE = 0.2   # LeakyReLU negative slope


def _round_up(x, m):
    return ((x + m - 1) // m) * m


def _ln_lrelu(h, gamma, beta):
    """LayerNorm over the last dim + LeakyReLU(0.2), in f32.

    var computed as E[h^2] - mu^2 (reductions over h and h*h, no extra
    full-width (h - mu) pass); LeakyReLU as one vmax instead of cmp+select.
    Note: zero-padded batch rows give mu=0, var=0 -> rsqrt(eps): finite values,
    and those rows are sliced away in the wrapper.
    """
    mu = jnp.mean(h, axis=-1, keepdims=True)
    ms = jnp.mean(h * h, axis=-1, keepdims=True)
    var = jnp.maximum(ms - mu * mu, 0.0)
    hn = (h - mu) * jax.lax.rsqrt(var + LN_EPS)
    hn = hn * gamma + beta
    return jnp.maximum(hn, NEG_SLOPE * hn)


def length_estimator_kernel(
    x_ref,
    w1_ref, b1_ref, g1_ref, be1_ref,
    w2_ref, b2_ref, g2_ref, be2_ref,
    w3_ref, b3_ref, g3_ref, be3_ref,
    w4_ref, b4_ref,
    o_ref,
):
    # Linear(input_size, 512) -> LayerNorm(512) -> LeakyReLU(0.2) -> Dropout(0.2)
    # bf16 MXU operands, f32 accumulation; elementwise math in f32.
    h = jnp.dot(x_ref[...], w1_ref[...],
                preferred_element_type=jnp.float32) + b1_ref[...]
    h = _ln_lrelu(h, g1_ref[...], be1_ref[...])
    # TODO(synk): Dropout(0.2) is eval-mode identity; training-mode masking not implemented.

    # Linear(512, 256) -> LayerNorm(256) -> LeakyReLU(0.2) -> Dropout(0.2)
    h = jnp.dot(h.astype(jnp.bfloat16), w2_ref[...],
                preferred_element_type=jnp.float32) + b2_ref[...]
    h = _ln_lrelu(h, g2_ref[...], be2_ref[...])

    # Linear(256, 128) -> LayerNorm(128) -> LeakyReLU(0.2)
    h = jnp.dot(h.astype(jnp.bfloat16), w3_ref[...],
                preferred_element_type=jnp.float32) + b3_ref[...]
    h = _ln_lrelu(h, g3_ref[...], be3_ref[...])

    # Linear(128, output_size_padded) in f32 (padded columns are exact zeros).
    out = jnp.dot(h, w4_ref[...], preferred_element_type=jnp.float32) + b4_ref[...]
    o_ref[...] = out.astype(o_ref.dtype)


def init_params(key, input_size, output_size, dtype=jnp.float32):
    """Deterministic init matching the module's __init_weights:
       Linear.weight ~ N(0, 0.02), Linear.bias = 0, LayerNorm: weight=1, bias=0."""
    nd = ND
    ks = jax.random.split(key, 4)
    params = {
        # weights stored (in, out) for x @ W
        "w1": (0.02 * jax.random.normal(ks[0], (input_size, nd))).astype(dtype),
        "b1": jnp.zeros((1, nd), dtype),
        "g1": jnp.ones((1, nd), dtype),
        "be1": jnp.zeros((1, nd), dtype),
        "w2": (0.02 * jax.random.normal(ks[1], (nd, nd // 2))).astype(dtype),
        "b2": jnp.zeros((1, nd // 2), dtype),
        "g2": jnp.ones((1, nd // 2), dtype),
        "be2": jnp.zeros((1, nd // 2), dtype),
        "w3": (0.02 * jax.random.normal(ks[2], (nd // 2, nd // 4))).astype(dtype),
        "b3": jnp.zeros((1, nd // 4), dtype),
        "g3": jnp.ones((1, nd // 4), dtype),
        "be3": jnp.zeros((1, nd // 4), dtype),
        "w4": (0.02 * jax.random.normal(ks[3], (nd // 4, output_size))).astype(dtype),
        "b4": jnp.zeros((1, output_size), dtype),
    }
    return params


def prepare_params(params):
    """One-time parameter preparation (hoisted out of the per-call hot path):
    dtype casts, K-dim zero-pad of w1 to a multiple of 128, and lane-dim
    zero-pad of the last Linear to 128 output lanes (padded cols are exact 0)."""
    f32, bf16 = jnp.float32, jnp.bfloat16
    d_in = params["w1"].shape[0]
    d_out = params["w4"].shape[1]
    d_in_pad = _round_up(d_in, 128)
    d_out_pad = _round_up(max(d_out, 128), 128)

    w1p = jnp.zeros((d_in_pad, ND), f32)
    w1p = w1p.at[:d_in, :].set(params["w1"].astype(f32)).astype(bf16)
    w4p = jnp.zeros((ND // 4, d_out_pad), f32)
    w4p = w4p.at[:, :d_out].set(params["w4"].astype(f32))
    b4p = jnp.zeros((1, d_out_pad), f32).at[:, :d_out].set(params["b4"].astype(f32))

    return (
        w1p, params["b1"].astype(f32), params["g1"].astype(f32), params["be1"].astype(f32),
        params["w2"].astype(bf16), params["b2"].astype(f32),
        params["g2"].astype(f32), params["be2"].astype(f32),
        params["w3"].astype(bf16), params["b3"].astype(f32),
        params["g3"].astype(f32), params["be3"].astype(f32),
        w4p, b4p,
    )


@functools.partial(jax.jit, static_argnames=("out_features", "block_m"))
def length_estimator_forward(x, prepared, *, out_features, block_m=512):
    B, d_in = x.shape
    d_in_pad = prepared[0].shape[0]     # padded K of layer 1
    d_out_pad = prepared[-1].shape[1]   # padded output lanes (multiple of 128)

    # ---- choose the batch tile --------------------------------------------
    # Small/medium batches: one grid step (no per-step overhead, full MXU M).
    # Large batches: tiles of `block_m` rows (amortizes the ~0.35us/step cost).
    B8 = _round_up(B, 8)
    if B8 <= 512:
        bm = B8
    else:
        bm = min(_round_up(block_m, 8), 1024)
    B_pad = _round_up(B8, bm)

    # ---- input: zero-pad batch to the tile and K to 128 lanes, cast bf16 ----
    x_p = jnp.pad(x, ((0, B_pad - B), (0, d_in_pad - d_in))).astype(jnp.bfloat16)

    # Parameters are small (<1.3 MiB total) -> each is a single full block kept
    # resident in VMEM; only the batch dimension of x / out is tiled.
    def full_spec(p):
        return pl.BlockSpec(p.shape, lambda i: (0, 0))

    grid = (B_pad // bm,)
    out = pl.pallas_call(
        length_estimator_kernel,
        out_shape=jax.ShapeDtypeStruct((B_pad, d_out_pad), jnp.float32),
        grid_spec=pltpu.PrefetchScalarGridSpec(
            num_scalar_prefetch=0,
            grid=grid,
            in_specs=[pl.BlockSpec((bm, d_in_pad), lambda i: (i, 0))]
            + [full_spec(p) for p in prepared],
            out_specs=pl.BlockSpec((bm, d_out_pad), lambda i: (i, 0)),
        ),
        compiler_params=pltpu.CompilerParams(
            dimension_semantics=("parallel",) if grid[0] > 1 else ("arbitrary",),
            vmem_limit_bytes=32 * 1024 * 1024,
        ),
    )(x_p, *prepared)

    return out[:B, :out_features].astype(x.dtype)


def reference_forward(x, params):
    """Pure-JAX reference of the same forward pass (eval mode), mirroring the
    kernel's dtype choices: bf16 operands / f32 accumulation for layers 1-3,
    f32 for the final logits layer."""
    bf16 = jnp.bfloat16

    def ln_lrelu(h, g, b):
        mu = jnp.mean(h, axis=-1, keepdims=True)
        ms = jnp.mean(h * h, axis=-1, keepdims=True)
        var = jnp.maximum(ms - mu * mu, 0.0)
        hn = (h - mu) * jax.lax.rsqrt(var + LN_EPS) * g + b
        return jnp.maximum(hn, NEG_SLOPE * hn)

    h = jnp.dot(x.astype(bf16), params["w1"].astype(bf16),
                preferred_element_type=jnp.float32) + params["b1"]
    h = ln_lrelu(h, params["g1"], params["be1"])
    h = jnp.dot(h.astype(bf16), params["w2"].astype(bf16),
                preferred_element_type=jnp.float32) + params["b2"]
    h = ln_lrelu(h, params["g2"], params["be2"])
    h = jnp.dot(h.astype(bf16), params["w3"].astype(bf16),
                preferred_element_type=jnp.float32) + params["b3"]
    h = ln_lrelu(h, params["g3"], params["be3"])
    return jnp.dot(h, params["w4"], preferred_element_type=jnp.float32,
                   precision=jax.lax.Precision.HIGHEST) + params["b4"]


if __name__ == "__main__":
    B = 32             # batch
    INPUT_SIZE = 64    # text embedding size
    OUTPUT_SIZE = 50   # number of length bins

    key = jax.random.PRNGKey(0)
    k_x, k_p = jax.random.split(key)
    x = jax.random.normal(k_x, (B, INPUT_SIZE), dtype=jnp.float32)
    params = init_params(k_p, INPUT_SIZE, OUTPUT_SIZE)

    # One-time parameter preparation (casts + padding), reused across calls.
    prepared = prepare_params(params)

    out = length_estimator_forward(x, prepared, out_features=OUTPUT_SIZE)
    out = jax.block_until_ready(out)

    ref = reference_forward(x, params)
    assert out.shape == (B, OUTPUT_SIZE)
    assert jnp.allclose(out, ref, atol=3e-3, rtol=3e-3), "mismatch vs reference"

    print("KERNEL_OK")
</pallas_src>

<mosaic_0001>
module attributes {stable_mosaic.version = 11 : i64} {
  func.func @length_estimator_kernel(%arg0: i32, %arg1: memref<32x128xbf16, #tpu.memory_space<vmem>>, %arg2: memref<128x512xbf16, #tpu.memory_space<vmem>>, %arg3: memref<1x512xf32, #tpu.memory_space<vmem>>, %arg4: memref<1x512xf32, #tpu.memory_space<vmem>>, %arg5: memref<1x512xf32, #tpu.memory_space<vmem>>, %arg6: memref<512x256xbf16, #tpu.memory_space<vmem>>, %arg7: memref<1x256xf32, #tpu.memory_space<vmem>>, %arg8: memref<1x256xf32, #tpu.memory_space<vmem>>, %arg9: memref<1x256xf32, #tpu.memory_space<vmem>>, %arg10: memref<256x128xbf16, #tpu.memory_space<vmem>>, %arg11: memref<1x128xf32, #tpu.memory_space<vmem>>, %arg12: memref<1x128xf32, #tpu.memory_space<vmem>>, %arg13: memref<1x128xf32, #tpu.memory_space<vmem>>, %arg14: memref<128x128xf32, #tpu.memory_space<vmem>>, %arg15: memref<1x128xf32, #tpu.memory_space<vmem>>, %arg16: memref<32x128xf32, #tpu.memory_space<vmem>>) attributes {dimension_semantics = [#tpu.dimension_semantics<arbitrary>], iteration_bounds = array<i64: 1>, scalar_prefetch = 0 : i64, scratch_operands = 0 : i64, tpu.core_type = #tpu.core_type<tc>, window_params = [{transform_indices = @transform_0, window_bounds = array<i64: 32, 128>}, {pipeline_mode = #tpu.pipeline_mode<synchronous>, transform_indices = @transform_1, window_bounds = array<i64: 128, 512>}, {pipeline_mode = #tpu.pipeline_mode<synchronous>, transform_indices = @transform_2, window_bounds = array<i64: 1, 512>}, {pipeline_mode = #tpu.pipeline_mode<synchronous>, transform_indices = @transform_3, window_bounds = array<i64: 1, 512>}, {pipeline_mode = #tpu.pipeline_mode<synchronous>, transform_indices = @transform_4, window_bounds = array<i64: 1, 512>}, {pipeline_mode = #tpu.pipeline_mode<synchronous>, transform_indices = @transform_5, window_bounds = array<i64: 512, 256>}, {pipeline_mode = #tpu.pipeline_mode<synchronous>, transform_indices = @transform_6, window_bounds = array<i64: 1, 256>}, {pipeline_mode = #tpu.pipeline_mode<synchronous>, transform_indices = @transform_7, window_bounds = array<i64: 1, 256>}, {pipeline_mode = #tpu.pipeline_mode<synchronous>, transform_indices = @transform_8, window_bounds = array<i64: 1, 256>}, {pipeline_mode = #tpu.pipeline_mode<synchronous>, transform_indices = @transform_9, window_bounds = array<i64: 256, 128>}, {pipeline_mode = #tpu.pipeline_mode<synchronous>, transform_indices = @transform_10, window_bounds = array<i64: 1, 128>}, {pipeline_mode = #tpu.pipeline_mode<synchronous>, transform_indices = @transform_11, window_bounds = array<i64: 1, 128>}, {pipeline_mode = #tpu.pipeline_mode<synchronous>, transform_indices = @transform_12, window_bounds = array<i64: 1, 128>}, {pipeline_mode = #tpu.pipeline_mode<synchronous>, transform_indices = @transform_13, window_bounds = array<i64: 128, 128>}, {pipeline_mode = #tpu.pipeline_mode<synchronous>, transform_indices = @transform_14, window_bounds = array<i64: 1, 128>}, {transform_indices = @transform_15, window_bounds = array<i64: 32, 128>}]} {
    %c0 = arith.constant 0 : index
    %c0_0 = arith.constant 0 : index
    %0 = vector.load %arg1[%c0, %c0_0] : memref<32x128xbf16, #tpu.memory_space<vmem>>, vector<32x128xbf16>
    %c0_1 = arith.constant 0 : index
    %c0_2 = arith.constant 0 : index
    %1 = vector.load %arg2[%c0_1, %c0_2] : memref<128x512xbf16, #tpu.memory_space<vmem>>, vector<128x512xbf16>
    %cst = arith.constant dense<0.000000e+00> : vector<32x512xf32>
    %2 = tpu.matmul %0, %1, %cst {dimension_numbers = #tpu.dot_dimension_numbers<[1], [0], [0], [1], [0, 0, 1, 1], [], []>} : vector<32x128xbf16>, vector<128x512xbf16>, vector<32x512xf32> -> vector<32x512xf32>
    %c0_3 = arith.constant 0 : index
    %c0_4 = arith.constant 0 : index
    %3 = vector.load %arg3[%c0_3, %c0_4] : memref<1x512xf32, #tpu.memory_space<vmem>>, vector<1x512xf32>
    %4 = vector.broadcast %3 : vector<1x512xf32> to vector<32x512xf32>
    %5 = arith.addf %2, %4 : vector<32x512xf32>
    %c0_5 = arith.constant 0 : index
    %c0_6 = arith.constant 0 : index
    %6 = vector.load %arg4[%c0_5, %c0_6] : memref<1x512xf32, #tpu.memory_space<vmem>>, vector<1x512xf32>
    %c0_7 = arith.constant 0 : index
    %c0_8 = arith.constant 0 : index
    %7 = vector.load %arg5[%c0_7, %c0_8] : memref<1x512xf32, #tpu.memory_space<vmem>>, vector<1x512xf32>
    %cst_9 = arith.constant dense<0.000000e+00> : vector<32xf32>
    %8 = vector.multi_reduction <add>, %5, %cst_9 [1] : vector<32x512xf32> to vector<32xf32>
    %9 = vector.shape_cast %8 : vector<32xf32> to vector<32x1xf32>
    %cst_10 = arith.constant 5.120000e+02 : f32
    %10 = vector.broadcast %cst_10 : f32 to vector<32x1xf32>
    %11 = arith.divf %9, %10 : vector<32x1xf32>
    %12 = arith.mulf %5, %5 : vector<32x512xf32>
    %cst_11 = arith.constant dense<0.000000e+00> : vector<32xf32>
    %13 = vector.multi_reduction <add>, %12, %cst_11 [1] : vector<32x512xf32> to vector<32xf32>
    %14 = vector.shape_cast %13 : vector<32xf32> to vector<32x1xf32>
    %cst_12 = arith.constant 5.120000e+02 : f32
    %15 = vector.broadcast %cst_12 : f32 to vector<32x1xf32>
    %16 = arith.divf %14, %15 : vector<32x1xf32>
    %17 = arith.mulf %11, %11 : vector<32x1xf32>
    %18 = arith.subf %16, %17 : vector<32x1xf32>
    %cst_13 = arith.constant 0.000000e+00 : f32
    %19 = vector.broadcast %cst_13 : f32 to vector<32x1xf32>
    %20 = arith.maximumf %18, %19 : vector<32x1xf32>
    %21 = vector.broadcast %11 : vector<32x1xf32> to vector<32x512xf32>
    %22 = arith.subf %5, %21 : vector<32x512xf32>
    %cst_14 = arith.constant 9.99999974E-6 : f32
    %23 = vector.broadcast %cst_14 : f32 to vector<32x1xf32>
    %24 = arith.addf %20, %23 : vector<32x1xf32>
    %25 = math.rsqrt %24 : vector<32x1xf32>
    %26 = vector.broadcast %25 : vector<32x1xf32> to vector<32x512xf32>
    %27 = arith.mulf %22, %26 : vector<32x512xf32>
    %28 = vector.broadcast %6 : vector<1x512xf32> to vector<32x512xf32>
    %29 = arith.mulf %27, %28 : vector<32x512xf32>
    %30 = vector.broadcast %7 : vector<1x512xf32> to vector<32x512xf32>
    %31 = arith.addf %29, %30 : vector<32x512xf32>
    %cst_15 = arith.constant 2.000000e-01 : f32
    %32 = vector.broadcast %cst_15 : f32 to vector<32x512xf32>
    %33 = arith.mulf %32, %31 : vector<32x512xf32>
    %34 = arith.maximumf %31, %33 : vector<32x512xf32>
    %35 = arith.truncf %34 : vector<32x512xf32> to vector<32x512xbf16>
    %c0_16 = arith.constant 0 : index
    %c0_17 = arith.constant 0 : index
    %36 = vector.load %arg6[%c0_16, %c0_17] : memref<512x256xbf16, #tpu.memory_space<vmem>>, vector<512x256xbf16>
    %cst_18 = arith.constant dense<0.000000e+00> : vector<32x256xf32>
    %37 = tpu.matmul %35, %36, %cst_18 {dimension_numbers = #tpu.dot_dimension_numbers<[1], [0], [0], [1], [0, 0, 1, 1], [], []>} : vector<32x512xbf16>, vector<512x256xbf16>, vector<32x256xf32> -> vector<32x256xf32>
    %c0_19 = arith.constant 0 : index
    %c0_20 = arith.constant 0 : index
    %38 = vector.load %arg7[%c0_19, %c0_20] : memref<1x256xf32, #tpu.memory_space<vmem>>, vector<1x256xf32>
    %39 = vector.broadcast %38 : vector<1x256xf32> to vector<32x256xf32>
    %40 = arith.addf %37, %39 : vector<32x256xf32>
    %c0_21 = arith.constant 0 : index
    %c0_22 = arith.constant 0 : index
    %41 = vector.load %arg8[%c0_21, %c0_22] : memref<1x256xf32, #tpu.memory_space<vmem>>, vector<1x256xf32>
    %c0_23 = arith.constant 0 : index
    %c0_24 = arith.constant 0 : index
    %42 = vector.load %arg9[%c0_23, %c0_24] : memref<1x256xf32, #tpu.memory_space<vmem>>, vector<1x256xf32>
    %cst_25 = arith.constant dense<0.000000e+00> : vector<32xf32>
    %43 = vector.multi_reduction <add>, %40, %cst_25 [1] : vector<32x256xf32> to vector<32xf32>
    %44 = vector.shape_cast %43 : vector<32xf32> to vector<32x1xf32>
    %cst_26 = arith.constant 2.560000e+02 : f32
    %45 = vector.broadcast %cst_26 : f32 to vector<32x1xf32>
    %46 = arith.divf %44, %45 : vector<32x1xf32>
    %47 = arith.mulf %40, %40 : vector<32x256xf32>
    %cst_27 = arith.constant dense<0.000000e+00> : vector<32xf32>
    %48 = vector.multi_reduction <add>, %47, %cst_27 [1] : vector<32x256xf32> to vector<32xf32>
    %49 = vector.shape_cast %48 : vector<32xf32> to vector<32x1xf32>
    %cst_28 = arith.constant 2.560000e+02 : f32
    %50 = vector.broadcast %cst_28 : f32 to vector<32x1xf32>
    %51 = arith.divf %49, %50 : vector<32x1xf32>
    %52 = arith.mulf %46, %46 : vector<32x1xf32>
    %53 = arith.subf %51, %52 : vector<32x1xf32>
    %cst_29 = arith.constant 0.000000e+00 : f32
    %54 = vector.broadcast %cst_29 : f32 to vector<32x1xf32>
    %55 = arith.maximumf %53, %54 : vector<32x1xf32>
    %56 = vector.broadcast %46 : vector<32x1xf32> to vector<32x256xf32>
    %57 = arith.subf %40, %56 : vector<32x256xf32>
    %cst_30 = arith.constant 9.99999974E-6 : f32
    %58 = vector.broadcast %cst_30 : f32 to vector<32x1xf32>
    %59 = arith.addf %55, %58 : vector<32x1xf32>
    %60 = math.rsqrt %59 : vector<32x1xf32>
    %61 = vector.broadcast %60 : vector<32x1xf32> to vector<32x256xf32>
    %62 = arith.mulf %57, %61 : vector<32x256xf32>
    %63 = vector.broadcast %41 : vector<1x256xf32> to vector<32x256xf32>
    %64 = arith.mulf %62, %63 : vector<32x256xf32>
    %65 = vector.broadcast %42 : vector<1x256xf32> to vector<32x256xf32>
    %66 = arith.addf %64, %65 : vector<32x256xf32>
    %cst_31 = arith.constant 2.000000e-01 : f32
    %67 = vector.broadcast %cst_31 : f32 to vector<32x256xf32>
    %68 = arith.mulf %67, %66 : vector<32x256xf32>
    %69 = arith.maximumf %66, %68 : vector<32x256xf32>
    %70 = arith.truncf %69 : vector<32x256xf32> to vector<32x256xbf16>
    %c0_32 = arith.constant 0 : index
    %c0_33 = arith.constant 0 : index
    %71 = vector.load %arg10[%c0_32, %c0_33] : memref<256x128xbf16, #tpu.memory_space<vmem>>, vector<256x128xbf16>
    %cst_34 = arith.constant dense<0.000000e+00> : vector<32x128xf32>
    %72 = tpu.matmul %70, %71, %cst_34 {dimension_numbers = #tpu.dot_dimension_numbers<[1], [0], [0], [1], [0, 0, 1, 1], [], []>} : vector<32x256xbf16>, vector<256x128xbf16>, vector<32x128xf32> -> vector<32x128xf32>
    %c0_35 = arith.constant 0 : index
    %c0_36 = arith.constant 0 : index
    %73 = vector.load %arg11[%c0_35, %c0_36] : memref<1x128xf32, #tpu.memory_space<vmem>>, vector<1x128xf32>
    %74 = vector.broadcast %73 : vector<1x128xf32> to vector<32x128xf32>
    %75 = arith.addf %72, %74 : vector<32x128xf32>
    %c0_37 = arith.constant 0 : index
    %c0_38 = arith.constant 0 : index
    %76 = vector.load %arg12[%c0_37, %c0_38] : memref<1x128xf32, #tpu.memory_space<vmem>>, vector<1x128xf32>
    %c0_39 = arith.constant 0 : index
    %c0_40 = arith.constant 0 : index
    %77 = vector.load %arg13[%c0_39, %c0_40] : memref<1x128xf32, #tpu.memory_space<vmem>>, vector<1x128xf32>
    %cst_41 = arith.constant dense<0.000000e+00> : vector<32xf32>
    %78 = vector.multi_reduction <add>, %75, %cst_41 [1] : vector<32x128xf32> to vector<32xf32>
    %79 = vector.shape_cast %78 : vector<32xf32> to vector<32x1xf32>
    %cst_42 = arith.constant 1.280000e+02 : f32
    %80 = vector.broadcast %cst_42 : f32 to vector<32x1xf32>
    %81 = arith.divf %79, %80 : vector<32x1xf32>
    %82 = arith.mulf %75, %75 : vector<32x128xf32>
    %cst_43 = arith.constant dense<0.000000e+00> : vector<32xf32>
    %83 = vector.multi_reduction <add>, %82, %cst_43 [1] : vector<32x128xf32> to vector<32xf32>
    %84 = vector.shape_cast %83 : vector<32xf32> to vector<32x1xf32>
    %cst_44 = arith.constant 1.280000e+02 : f32
    %85 = vector.broadcast %cst_44 : f32 to vector<32x1xf32>
    %86 = arith.divf %84, %85 : vector<32x1xf32>
    %87 = arith.mulf %81, %81 : vector<32x1xf32>
    %88 = arith.subf %86, %87 : vector<32x1xf32>
    %cst_45 = arith.constant 0.000000e+00 : f32
    %89 = vector.broadcast %cst_45 : f32 to vector<32x1xf32>
    %90 = arith.maximumf %88, %89 : vector<32x1xf32>
    %91 = vector.broadcast %81 : vector<32x1xf32> to vector<32x128xf32>
    %92 = arith.subf %75, %91 : vector<32x128xf32>
    %cst_46 = arith.constant 9.99999974E-6 : f32
    %93 = vector.broadcast %cst_46 : f32 to vector<32x1xf32>
    %94 = arith.addf %90, %93 : vector<32x1xf32>
    %95 = math.rsqrt %94 : vector<32x1xf32>
    %96 = vector.broadcast %95 : vector<32x1xf32> to vector<32x128xf32>
    %97 = arith.mulf %92, %96 : vector<32x128xf32>
    %98 = vector.broadcast %76 : vector<1x128xf32> to vector<32x128xf32>
    %99 = arith.mulf %97, %98 : vector<32x128xf32>
    %100 = vector.broadcast %77 : vector<1x128xf32> to vector<32x128xf32>
    %101 = arith.addf %99, %100 : vector<32x128xf32>
    %cst_47 = arith.constant 2.000000e-01 : f32
    %102 = vector.broadcast %cst_47 : f32 to vector<32x128xf32>
    %103 = arith.mulf %102, %101 : vector<32x128xf32>
    %104 = arith.maximumf %101, %103 : vector<32x128xf32>
    %c0_48 = arith.constant 0 : index
    %c0_49 = arith.constant 0 : index
    %105 = vector.load %arg14[%c0_48, %c0_49] : memref<128x128xf32, #tpu.memory_space<vmem>>, vector<128x128xf32>
    %cst_50 = arith.constant dense<0.000000e+00> : vector<32x128xf32>
    %106 = tpu.matmul %104, %105, %cst_50 {dimension_numbers = #tpu.dot_dimension_numbers<[1], [0], [0], [1], [0, 0, 1, 1], [], []>} : vector<32x128xf32>, vector<128x128xf32>, vector<32x128xf32> -> vector<32x128xf32>
    %c0_51 = arith.constant 0 : index
    %c0_52 = arith.constant 0 : index
    %107 = vector.load %arg15[%c0_51, %c0_52] : memref<1x128xf32, #tpu.memory_space<vmem>>, vector<1x128xf32>
    %108 = vector.broadcast %107 : vector<1x128xf32> to vector<32x128xf32>
    %109 = arith.addf %106, %108 : vector<32x128xf32>
    %c0_53 = arith.constant 0 : index
    %c0_54 = arith.constant 0 : index
    %110 = vector.load %arg16[%c0_53, %c0_54] : memref<32x128xf32, #tpu.memory_space<vmem>>, vector<32x128xf32>
    tpu.vector_store %arg16[%c0_53, %c0_54], %109 {strides = array<i32>} : memref<32x128xf32, #tpu.memory_space<vmem>>, vector<32x128xf32>,
    return
  }
  func.func @transform_0(%arg0: i32) -> (i32, i32) {
    %c0_i32 = arith.constant 0 : i32
    %c0_i32_0 = arith.constant 0 : i32
    return %arg0, %c0_i32 : i32, i32
  }
  func.func @transform_1(%arg0: i32) -> (i32, i32) {
    %c0_i32 = arith.constant 0 : i32
    %c0_i32_0 = arith.constant 0 : i32
    %c0_i32_1 = arith.constant 0 : i32
    return %c0_i32, %c0_i32_0 : i32, i32
  }
  func.func @transform_2(%arg0: i32) -> (i32, i32) {
    %c0_i32 = arith.constant 0 : i32
    %c0_i32_0 = arith.constant 0 : i32
    %c0_i32_1 = arith.constant 0 : i32
    return %c0_i32, %c0_i32_0 : i32, i32
  }
  func.func @transform_3(%arg0: i32) -> (i32, i32) {
    %c0_i32 = arith.constant 0 : i32
    %c0_i32_0 = arith.constant 0 : i32
    %c0_i32_1 = arith.constant 0 : i32
    return %c0_i32, %c0_i32_0 : i32, i32
  }
  func.func @transform_4(%arg0: i32) -> (i32, i32) {
    %c0_i32 = arith.constant 0 : i32
    %c0_i32_0 = arith.constant 0 : i32
    %c0_i32_1 = arith.constant 0 : i32
    return %c0_i32, %c0_i32_0 : i32, i32
  }
  func.func @transform_5(%arg0: i32) -> (i32, i32) {
    %c0_i32 = arith.constant 0 : i32
    %c0_i32_0 = arith.constant 0 : i32
    %c0_i32_1 = arith.constant 0 : i32
    return %c0_i32, %c0_i32_0 : i32, i32
  }
  func.func @transform_6(%arg0: i32) -> (i32, i32) {
    %c0_i32 = arith.constant 0 : i32
    %c0_i32_0 = arith.constant 0 : i32
    %c0_i32_1 = arith.constant 0 : i32
    return %c0_i32, %c0_i32_0 : i32, i32
  }
  func.func @transform_7(%arg0: i32) -> (i32, i32) {
    %c0_i32 = arith.constant 0 : i32
    %c0_i32_0 = arith.constant 0 : i32
    %c0_i32_1 = arith.constant 0 : i32
    return %c0_i32, %c0_i32_0 : i32, i32
  }
  func.func @transform_8(%arg0: i32) -> (i32, i32) {
    %c0_i32 = arith.constant 0 : i32
    %c0_i32_0 = arith.constant 0 : i32
    %c0_i32_1 = arith.constant 0 : i32
    return %c0_i32, %c0_i32_0 : i32, i32
  }
  func.func @transform_9(%arg0: i32) -> (i32, i32) {
    %c0_i32 = arith.constant 0 : i32
    %c0_i32_0 = arith.constant 0 : i32
    %c0_i32_1 = arith.constant 0 : i32
    return %c0_i32, %c0_i32_0 : i32, i32
  }
  func.func @transform_10(%arg0: i32) -> (i32, i32) {
    %c0_i32 = arith.constant 0 : i32
    %c0_i32_0 = arith.constant 0 : i32
    %c0_i32_1 = arith.constant 0 : i32
    return %c0_i32, %c0_i32_0 : i32, i32
  }
  func.func @transform_11(%arg0: i32) -> (i32, i32) {
    %c0_i32 = arith.constant 0 : i32
    %c0_i32_0 = arith.constant 0 : i32
    %c0_i32_1 = arith.constant 0 : i32
    return %c0_i32, %c0_i32_0 : i32, i32
  }
  func.func @transform_12(%arg0: i32) -> (i32, i32) {
    %c0_i32 = arith.constant 0 : i32
    %c0_i32_0 = arith.constant 0 : i32
    %c0_i32_1 = arith.constant 0 : i32
    return %c0_i32, %c0_i32_0 : i32, i32
  }
  func.func @transform_13(%arg0: i32) -> (i32, i32) {
    %c0_i32 = arith.constant 0 : i32
    %c0_i32_0 = arith.constant 0 : i32
    %c0_i32_1 = arith.constant 0 : i32
    return %c0_i32, %c0_i32_0 : i32, i32
  }
  func.func @transform_14(%arg0: i32) -> (i32, i32) {
    %c0_i32 = arith.constant 0 : i32
    %c0_i32_0 = arith.constant 0 : i32
    %c0_i32_1 = arith.constant 0 : i32
    return %c0_i32, %c0_i32_0 : i32, i32
  }
  func.func @transform_15(%arg0: i32) -> (i32, i32) {
    %c0_i32 = arith.constant 0 : i32
    %c0_i32_0 = arith.constant 0 : i32
    return %arg0, %c0_i32 : i32, i32
  }
}

</mosaic_0001>

<bundles_post_ra>
// kernel: length_estimator_forward.1
= control target key start
LH: loop header
LB: loop body
LE: loop exit
PB: predicated region body
PF: predicated region fallthrough
CT: control target
= control target key end

     0   :  { %20 = vsyncpa [#allocation3], 0  ;;  %s3147_s0 = inlined_call_operand.vmem [shape: bf16[32,128], index: 0, kind: input, shape index: {}]   ;;  %s3148_s1 = inlined_call_operand.hbm [shape: bf16[128,512], index: 1, kind: input, shape index: {}]   ;;  %s3149_s2 = inlined_call_operand.hbm [shape: f32[1,512], index: 2, kind: input, shape index: {}]   ;;  %s3150_s3 = inlined_call_operand.hbm [shape: f32[1,512], index: 3, kind: input, shape index: {}]   ;;  %s3151_s4 = inlined_call_operand.hbm [shape: f32[1,512], index: 4, kind: input, shape index: {}]   ;;  %s3152_s5 = inlined_call_operand.hbm [shape: bf16[512,256], index: 5, kind: input, shape index: {}]   ;;  %s3153_s6 = inlined_call_operand.vmem [shape: f32[1,256], index: 6, kind: input, shape index: {}]   ;;  %s3154_s7 = inlined_call_operand.hbm [shape: f32[1,256], index: 7, kind: input, shape index: {}]   ;;  %s3155_s8 = inlined_call_operand.hbm [shape: f32[1,256], index: 8, kind: input, shape index: {}]   ;;  %s3156_s9 = inlined_call_operand.hbm [shape: bf16[256,128], index: 9, kind: input, shape index: {}]   ;;  %s3157_s10 = inlined_call_operand.hbm [shape: f32[1,128], index: 10, kind: input, shape index: {}]   ;;  %s3158_s11 = inlined_call_operand.hbm [shape: f32[1,128], index: 11, kind: input, shape index: {}]   ;;  %s3159_s12 = inlined_call_operand.hbm [shape: f32[1,128], index: 12, kind: input, shape index: {}]   ;;  %s3160_s13 = inlined_call_operand.vmem [shape: f32[128,128], index: 13, kind: input, shape index: {}]   ;;  %s3161_s14 = inlined_call_operand.vmem [shape: f32[1,128], index: 14, kind: input, shape index: {}]   ;;  %s3162_s15 = inlined_call_operand.hbm [shape: f32[32,128], index: 15, kind: output, shape index: {}]  }
   0x1   :  { %21 = vsyncpa [#allocation6], 0 }
   0x2   :  { %22 = vsyncpa [#allocation9], 0 }
   0x3   :  { %23 = vsyncpa [#allocation12], 0 }
   0x4   :  { %24 = vsyncpa [#allocation15], 0 }
   0x5   :  { %25 = vsyncpa [#allocation18], 0 }
   0x6   :  { %26 = vsyncpa [#allocation4], 0  ;;  %s2533_s18 = smov [#allocation5]   ;;  %s2534_s20 = smov [#allocation8]  }
   0x7   :  { %s47_s19 = sshll.u32 %s2533_s18, 4  ;;  %s67_s21 = sshll.u32 %s2534_s20, 4  ;;  %s48_s19 = int_to_ptr.vmem [resolvable:$true] %s47_s19  ;;  %s68_s21 = int_to_ptr.vmem [resolvable:$true] %s67_s21 }
   0x8   :  { %s2255_s24 = scalar_lea.hbm %s3149_s2, 64 }
   0x9   :  { %p2256_p0 = scmp.ne.s32.totalorder %s3149_s2, %s2255_s24  ;;  %p2259_p1 = scmp.lt.u32.totalorder %s2255_s24, %s3149_s2 }
   0xb   :  { %p2261_p2 = pnand %p2259_p1, %p2256_p0 }
   0xd   :  { %2264 = shalt.err (!%p2261_p2)
}
   0xe   :  { %s2265_s29 = scalar_lea.vmem %s48_s19, 64  ;;  %p2270_p4 = scmp.lt.s32.totalorder %s48_s19, %s48_s19 }
   0xf   :  { %p2266_p3 = scmp.ne.s32.totalorder %s48_s19, %s2265_s29  ;;  %p2271_p5 = scmp.lt.s32.totalorder %s2265_s29, %s2265_s29 }
  0x11   :  { %p2272_p6 = por %p2271_p5, %p2270_p4 }
  0x13   :  { %p2273_p7 = pnand %p2272_p6, %p2266_p3 }
  0x15   :  { %2276 = shalt.err (!%p2273_p7)
}
  0x16   :  { %50 = dma.hbm_to_vmem [thread:$0]  %s3149_s2, 64, %s48_s19, [#allocation6]  }
  0x17   :  { %s2277_s20 = scalar_lea.hbm %s3151_s4, 64 }
  0x18   :  { %p2278_p8 = scmp.ne.s32.totalorder %s3151_s4, %s2277_s20  ;;  %p2281_p9 = scmp.lt.u32.totalorder %s2277_s20, %s3151_s4 }
  0x1a   :  { %p2283_p10 = pnand %p2281_p9, %p2278_p8 }
  0x1c   :  { %2286 = shalt.err (!%p2283_p10)
}
  0x1d   :  { %s2287_s26 = scalar_lea.vmem %s68_s21, 64  ;;  %p2292_p12 = scmp.lt.s32.totalorder %s68_s21, %s68_s21 }
  0x1e   :  { %p2288_p11 = scmp.ne.s32.totalorder %s68_s21, %s2287_s26  ;;  %p2293_p13 = scmp.lt.s32.totalorder %s2287_s26, %s2287_s26 }
  0x20   :  { %p2294_p0 = por %p2293_p13, %p2292_p12 }
  0x22   :  { %p2295_p1 = pnand %p2294_p0, %p2288_p11 }
  0x24   :  { %2298 = shalt.err (!%p2295_p1)
}
  0x25   :  { %70 = dma.hbm_to_vmem [thread:$0]  %s3151_s4, 64, %s68_s21, [#allocation9]  }
  0x26   :  { %s2535_s27 = smov [#allocation11]   ;;  %s2536_s29 = smov [#allocation14]  }
  0x27   :  { %s91_s28 = sshll.u32 %s2535_s27, 4  ;;  %s110_s30 = sshll.u32 %s2536_s29, 4  ;;  %s92_s28 = int_to_ptr.vmem [resolvable:$true] %s91_s28  ;;  %s2656_s30 = int_to_ptr.vmem [resolvable:$true] %s110_s30 }
  0x28   :  { %s2299_s18 = scalar_lea.hbm %s3154_s7, 32 }
  0x29   :  { %p2300_p2 = scmp.ne.s32.totalorder %s3154_s7, %s2299_s18  ;;  %p2303_p3 = scmp.lt.u32.totalorder %s2299_s18, %s3154_s7 }
  0x2b   :  { %p2305_p4 = pnand %p2303_p3, %p2300_p2 }
  0x2d   :  { %2308 = shalt.err (!%p2305_p4)
}
  0x2e   :  { %s2309_s4 = scalar_lea.vmem %s92_s28, 32  ;;  %p2314_p6 = scmp.lt.s32.totalorder %s92_s28, %s92_s28 }
  0x2f   :  { %p2310_p5 = scmp.ne.s32.totalorder %s92_s28, %s2309_s4  ;;  %p2315_p7 = scmp.lt.s32.totalorder %s2309_s4, %s2309_s4 }
  0x31   :  { %p2316_p8 = por %p2315_p7, %p2314_p6 }
  0x33   :  { %p2317_p9 = pnand %p2316_p8, %p2310_p5 }
  0x35   :  { %2320 = shalt.err (!%p2317_p9)
}
  0x36   :  { %94 = dma.hbm_to_vmem [thread:$0]  %s3154_s7, 32, %s92_s28, [#allocation12]  }
  0x37   :  { %s2321_s19 = scalar_lea.hbm %s3156_s9, 2048 }
  0x38   :  { %p2322_p10 = scmp.ne.s32.totalorder %s3156_s9, %s2321_s19  ;;  %p2325_p11 = scmp.lt.u32.totalorder %s2321_s19, %s3156_s9 }
  0x3a   :  { %p2327_p12 = pnand %p2325_p11, %p2322_p10 }
  0x3c   :  { %2330 = shalt.err (!%p2327_p12)
}
  0x3d   :  { %s2331_s18 = scalar_lea.vmem %s2656_s30, 2048  ;;  %p2336_p0 = scmp.lt.s32.totalorder %s2656_s30, %s2656_s30 }
  0x3e   :  { %p2332_p13 = scmp.ne.s32.totalorder %s2656_s30, %s2331_s18  ;;  %p2337_p1 = scmp.lt.s32.totalorder %s2331_s18, %s2331_s18 }
  0x40   :  { %p2338_p2 = por %p2337_p1, %p2336_p0 }
  0x42   :  { %p2339_p3 = pnand %p2338_p2, %p2332_p13 }
  0x44   :  { %2342 = shalt.err (!%p2339_p3)
}
  0x45   :  { %s2537_s7 = smov 64   ;;  %s2538_s28 = smov 4  }
  0x46   :  { %116 = dma.hbm_to_vmem [thread:$0]  %s3156_s9, 2048, %s2656_s30, [#allocation15], %s2537_s7, %s2537_s7, %s2538_s28  }
  0x47   :  { %s2539_s23 = smov [#allocation17]   ;;  %s2540_s4 = smov [#allocation2]  }
  0x48   :  { %s133_s24 = sshll.u32 %s2539_s23, 4  ;;  %s34_s21 = sshll.u32 %s2540_s4, 4  ;;  %s134_s24 = int_to_ptr.vmem [resolvable:$true] %s133_s24  ;;  %s2687_s21 = int_to_ptr.vmem [resolvable:$true] %s34_s21 }
  0x49   :  { %s2343_s2 = scalar_lea.hbm %s3158_s11, 16 }
  0x4a   :  { %p2344_p4 = scmp.ne.s32.totalorder %s3158_s11, %s2343_s2  ;;  %p2347_p5 = scmp.lt.u32.totalorder %s2343_s2, %s3158_s11 }
  0x4c   :  { %p2349_p6 = pnand %p2347_p5, %p2344_p4 }
  0x4e   :  { %2352 = shalt.err (!%p2349_p6)
}
  0x4f   :  { %s2353_s9 = scalar_lea.vmem %s134_s24, 16  ;;  %s2357_s30 = scalar_lea.vmem %s134_s24, 32 }
  0x50   :  { %p2354_p7 = scmp.ne.s32.totalorder %s134_s24, %s2353_s9  ;;  %p2358_p8 = scmp.lt.s32.totalorder %s134_s24, %s134_s24 }
  0x51   :  { %p2359_p9 = scmp.lt.s32.totalorder %s2357_s30, %s2353_s9 }
  0x53   :  { %p2360_p10 = por %p2359_p9, %p2358_p8 }
  0x55   :  { %p2361_p11 = pnand %p2360_p10, %p2354_p7 }
  0x57   :  { %2364 = shalt.err (!%p2361_p11)
}
  0x58   :  { %136 = dma.hbm_to_vmem [thread:$0]  %s3158_s11, 16, %s134_s24, [#allocation18]  }
  0x59   :  { %s2365_s20 = scalar_lea.hbm %s3148_s1, 4096 }
  0x5a   :  { %p2366_p12 = scmp.ne.s32.totalorder %s3148_s1, %s2365_s20  ;;  %p2369_p13 = scmp.lt.u32.totalorder %s2365_s20, %s3148_s1 }
  0x5c   :  { %p2371_p0 = pnand %p2369_p13, %p2366_p12 }
  0x5e   :  { %2374 = shalt.err (!%p2371_p0)
}
  0x5f   :  { %s2375_s26 = scalar_lea.vmem %s2687_s21, 4096  ;;  %p2380_p2 = scmp.lt.s32.totalorder %s2687_s21, %s2687_s21 }
  0x60   :  { %p2376_p1 = scmp.ne.s32.totalorder %s2687_s21, %s2375_s26  ;;  %p2381_p3 = scmp.lt.s32.totalorder %s2375_s26, %s2375_s26 }
  0x62   :  { %p2382_p4 = por %p2381_p3, %p2380_p2 }
  0x64   :  { %p2383_p5 = pnand %p2382_p4, %p2376_p1 }
  0x66   :  { %2386 = shalt.err (!%p2383_p5)
}
  0x67   :  { %s2541_s11 = smov 256   ;;  %s2542_s24 = smov 16  }
  0x68   :  { %40 = dma.hbm_to_vmem [thread:$0]  %s3148_s1, 4096, %s2687_s21, [#allocation3], %s2541_s11, %s2541_s11, %s2542_s24  }
  0x69   :  { %s2543_s27 = smov [#allocation7]   ;;  %s2544_s16 = smov [#allocation10]  }
  0x6a   :  { %s57_s29 = sshll.u32 %s2543_s27, 4  ;;  %s76_s9 = sshll.u32 %s2544_s16, 4  ;;  %s58_s29 = int_to_ptr.vmem [resolvable:$true] %s57_s29  ;;  %s2718_s9 = int_to_ptr.vmem [resolvable:$true] %s76_s9 }
  0x6b   :  { %s2387_s18 = scalar_lea.hbm %s3150_s3, 64 }
  0x6c   :  { %p2388_p6 = scmp.ne.s32.totalorder %s3150_s3, %s2387_s18  ;;  %p2391_p7 = scmp.lt.u32.totalorder %s2387_s18, %s3150_s3 }
  0x6e   :  { %p2393_p8 = pnand %p2391_p7, %p2388_p6 }
  0x70   :  { %2396 = shalt.err (!%p2393_p8)
}
  0x71   :  { %s2397_s1 = scalar_lea.vmem %s58_s29, 64  ;;  %p2402_p10 = scmp.lt.s32.totalorder %s58_s29, %s58_s29 }
  0x72   :  { %p2398_p9 = scmp.ne.s32.totalorder %s58_s29, %s2397_s1  ;;  %p2403_p11 = scmp.lt.s32.totalorder %s2397_s1, %s2397_s1 }
  0x74   :  { %p2404_p12 = por %p2403_p11, %p2402_p10 }
  0x76   :  { %p2405_p13 = pnand %p2404_p12, %p2398_p9 }
  0x78   :  { %2408 = shalt.err (!%p2405_p13)
}
  0x79   :  { %60 = dma.hbm_to_vmem [thread:$0]  %s3150_s3, 64, %s58_s29, [#allocation6]  }
  0x7a   :  { %s2409_s26 = scalar_lea.hbm %s3152_s5, 8192 }
  0x7b   :  { %p2410_p0 = scmp.ne.s32.totalorder %s3152_s5, %s2409_s26  ;;  %p2413_p1 = scmp.lt.u32.totalorder %s2409_s26, %s3152_s5 }
  0x7d   :  { %p2415_p2 = pnand %p2413_p1, %p2410_p0 }
  0x7f   :  { %2418 = shalt.err (!%p2415_p2)
}
  0x80   :  { %s2419_s27 = scalar_lea.vmem %s2718_s9, 8192  ;;  %p2424_p4 = scmp.lt.s32.totalorder %s2718_s9, %s2718_s9 }
  0x81   :  { %p2420_p3 = scmp.ne.s32.totalorder %s2718_s9, %s2419_s27  ;;  %p2425_p5 = scmp.lt.s32.totalorder %s2419_s27, %s2419_s27 }
  0x83   :  { %p2426_p6 = por %p2425_p5, %p2424_p4 }
  0x85   :  { %p2427_p7 = pnand %p2426_p6, %p2420_p3 }
  0x87   :  { %2430 = shalt.err (!%p2427_p7)
}
  0x88   :  { %s2545_s3 = smov 128   ;;  %s2546_s29 = smov 8  }
  0x89   :  { %82 = dma.hbm_to_vmem [thread:$0]  %s3152_s5, 8192, %s2718_s9, [#allocation9], %s2545_s3, %s2545_s3, %s2546_s29  }
  0x8a   :  { %s2547_s17 = smov [#allocation13]   ;;  %s2548_s7 = smov [#allocation16]  }
  0x8b   :  { %s101_s18 = sshll.u32 %s2547_s17, 4  ;;  %s123_s28 = sshll.u32 %s2548_s7, 4  ;;  %s102_s18 = int_to_ptr.vmem [resolvable:$true] %s101_s18  ;;  %s124_s28 = int_to_ptr.vmem [resolvable:$true] %s123_s28 }
  0x8c   :  { %s2431_s1 = scalar_lea.hbm %s3155_s8, 32 }
  0x8d   :  { %p2432_p8 = scmp.ne.s32.totalorder %s3155_s8, %s2431_s1  ;;  %p2435_p9 = scmp.lt.u32.totalorder %s2431_s1, %s3155_s8 }
  0x8f   :  { %p2437_p10 = pnand %p2435_p9, %p2432_p8 }
  0x91   :  { %2440 = shalt.err (!%p2437_p10)
}
  0x92   :  { %s2441_s5 = scalar_lea.vmem %s102_s18, 32  ;;  %p2446_p12 = scmp.lt.s32.totalorder %s102_s18, %s102_s18 }
  0x93   :  { %p2442_p11 = scmp.ne.s32.totalorder %s102_s18, %s2441_s5  ;;  %p2447_p13 = scmp.lt.s32.totalorder %s2441_s5, %s2441_s5 }
  0x95   :  { %p2448_p0 = por %p2447_p13, %p2446_p12 }
  0x97   :  { %p2449_p1 = pnand %p2448_p0, %p2442_p11 }
  0x99   :  { %2452 = shalt.err (!%p2449_p1)
}
  0x9a   :  { %104 = dma.hbm_to_vmem [thread:$0]  %s3155_s8, 32, %s102_s18, [#allocation12]  }
  0x9b   :  { %s2453_s2 = scalar_lea.hbm %s3157_s10, 16 }
  0x9c   :  { %p2454_p2 = scmp.ne.s32.totalorder %s3157_s10, %s2453_s2  ;;  %p2457_p3 = scmp.lt.u32.totalorder %s2453_s2, %s3157_s10 }
  0x9e   :  { %p2459_p4 = pnand %p2457_p3, %p2454_p2 }
  0xa0   :  { %2462 = shalt.err (!%p2459_p4)
}
  0xa1   :  { %s2463_s17 = scalar_lea.vmem %s124_s28, 16  ;;  %s2467_s7 = scalar_lea.vmem %s124_s28, 32 }
  0xa2   :  { %p2464_p5 = scmp.ne.s32.totalorder %s124_s28, %s2463_s17  ;;  %p2468_p6 = scmp.lt.s32.totalorder %s124_s28, %s124_s28 }
  0xa3   :  { %p2469_p7 = scmp.lt.s32.totalorder %s2467_s7, %s2463_s17 }
  0xa5   :  { %p2470_p8 = por %p2469_p7, %p2468_p6 }
  0xa7   :  { %p2471_p9 = pnand %p2470_p8, %p2464_p5 }
  0xa9   :  { %2474 = shalt.err (!%p2471_p9)
}
  0xaa   :  { %126 = dma.hbm_to_vmem [thread:$0]  %s3157_s10, 16, %s124_s28, [#allocation15]  }
  0xab   :  { %s2549_s20 = smov [#allocation19]   ;;  %s2475_s23 = scalar_lea.hbm %s3159_s12, 16 }
  0xac   :  { %s143_s22 = sshll.u32 %s2549_s20, 4  ;;  %p2476_p10 = scmp.ne.s32.totalorder %s3159_s12, %s2475_s23  ;;  %s144_s22 = int_to_ptr.vmem [resolvable:$true] %s143_s22 }
  0xad   :  { %p2479_p11 = scmp.lt.u32.totalorder %s2475_s23, %s3159_s12 }
  0xaf   :  { %p2481_p12 = pnand %p2479_p11, %p2476_p10 }
  0xb1   :  { %2484 = shalt.err (!%p2481_p12)
}
  0xb2   :  { %s2485_s26 = scalar_lea.vmem %s144_s22, 16  ;;  %s2489_s10 = scalar_lea.vmem %s144_s22, 32 }
  0xb3   :  { %p2486_p13 = scmp.ne.s32.totalorder %s144_s22, %s2485_s26  ;;  %p2490_p0 = scmp.lt.s32.totalorder %s144_s22, %s144_s22 }
  0xb4   :  { %p2491_p1 = scmp.lt.s32.totalorder %s2489_s10, %s2485_s26 }
  0xb6   :  { %p2492_p2 = por %p2491_p1, %p2490_p0 }
  0xb8   :  { %p2493_p3 = pnand %p2492_p2, %p2486_p13 }
  0xba   :  { %2496 = shalt.err (!%p2493_p3)
}
  0xbb   :  { %146 = dma.hbm_to_vmem [thread:$0]  %s3159_s12, 16, %s144_s22, [#allocation18]  }
  0xbc   :  { %2519 = dma.done.wait [#allocation3], 4096  }
  0xbd   :  { %2520 = vsyncadd [#allocation3], 4294963200 }
  0xbe   :  { %2521 = dma.done.wait [#allocation6], 128  }
  0xbf   :  { %2522 = vsyncadd [#allocation6], 4294967168 }
  0xc0   :  { %2523 = dma.done.wait [#allocation9], 8256  }
  0xc1   :  { %2524 = vsyncadd [#allocation9], 4294959040 }
  0xc2   :  { %2525 = dma.done.wait [#allocation12], 64  }
  0xc3   :  { %2526 = vsyncadd [#allocation12], 4294967232 }
  0xc4   :  { %2527 = dma.done.wait [#allocation15], 2064  }
  0xc5   :  { %2528 = vsyncadd [#allocation15], 4294965232 }
  0xc6   :  { %2529 = dma.done.wait [#allocation18], 32  }
  0xc7   :  { %2530 = vsyncadd [#allocation18], 4294967264  ;;  %v2550_v0 = vmov 0   ;;  %v2069_v1 = vld [vmem:[#allocation2 + $0x4] ss:$16 sps:$4 sm:$0xff]   ;;  %v2112_v23 = vld [vmem:[%s3147_s0 + $0x8] sm:$0xff]   ;;  %v223_v55 = vlaneseq }
  0xc8   :  { %447 = vmatprep.mubr.bf16.mxu1 %v2550_v0  ;;  %v2071_v2 = vld [vmem:[#allocation2] ss:$16 sps:$4 sm:$0xff]   ;;  %415 = vmatprep.subr.bf16.mxu1 %v2069_v1  ;;  %v2072_v3 = vld [vmem:[#allocation2 + $0x24] ss:$16 sps:$4 sm:$0xff]   ;;  %v2096_v17 = vld [vmem:[#allocation2 + $0xc] ss:$16 sps:$4 sm:$0xff]  }
  0xc9   :  { %416 = vmatpush1.bf16.msra.mxu1 %v2071_v2  ;;  %v2074_v4 = vld [vmem:[#allocation2 + $0x20] ss:$16 sps:$4 sm:$0xff]   ;;  %v2075_v5 = vld [vmem:[#allocation2 + $0x44] ss:$16 sps:$4 sm:$0xff]   ;;  %v2094_v19 = vld [vmem:[#allocation2 + $0x8] ss:$16 sps:$4 sm:$0xff]  }
  0xca   :  { %417 = vmatprep.subr.bf16.mxu1 %v2072_v3  ;;  %v2077_v6 = vld [vmem:[#allocation2 + $0x40] ss:$16 sps:$4 sm:$0xff]   ;;  %v2078_v7 = vld [vmem:[#allocation2 + $0x64] ss:$16 sps:$4 sm:$0xff]   ;;  %v2099_v20 = vld [vmem:[#allocation2 + $0x2c] ss:$16 sps:$4 sm:$0xff]  }
  0xcb   :  { %v2080_v8 = vld [vmem:[#allocation2 + $0x60] ss:$16 sps:$4 sm:$0xff]   ;;  %v2081_v9 = vld [vmem:[#allocation2 + $0x84] ss:$16 sps:$4 sm:$0xff]   ;;  %v2097_v21 = vld [vmem:[#allocation2 + $0x28] ss:$16 sps:$4 sm:$0xff]  }
  0xcc   :  { %v2083_v10 = vld [vmem:[#allocation2 + $0x80] ss:$16 sps:$4 sm:$0xff]   ;;  %v2084_v11 = vld [vmem:[#allocation2 + $0xa4] ss:$16 sps:$4 sm:$0xff]   ;;  %v2102_v22 = vld [vmem:[#allocation2 + $0x4c] ss:$16 sps:$4 sm:$0xff]  }
  0xcd   :  { %418 = vmatpush1.bf16.msra.mxu1 %v2074_v4  ;;  %v2086_v12 = vld [vmem:[#allocation2 + $0xa0] ss:$16 sps:$4 sm:$0xff]   ;;  %v2087_v13 = vld [vmem:[#allocation2 + $0xc4] ss:$16 sps:$4 sm:$0xff]   ;;  %v2100_v24 = vld [vmem:[#allocation2 + $0x48] ss:$16 sps:$4 sm:$0xff]  }
  0xce   :  { %419 = vmatprep.subr.bf16.mxu1 %v2075_v5  ;;  %v2089_v14 = vld [vmem:[#allocation2 + $0xc0] ss:$16 sps:$4 sm:$0xff]   ;;  %v2090_v15 = vld [vmem:[#allocation2 + $0xe4] ss:$16 sps:$4 sm:$0xff]   ;;  %v2105_v25 = vld [vmem:[#allocation2 + $0x6c] ss:$16 sps:$4 sm:$0xff]  }
  0xcf   :  { %v2092_v16 = vld [vmem:[#allocation2 + $0xe0] ss:$16 sps:$4 sm:$0xff]   ;;  %v2103_v26 = vld [vmem:[#allocation2 + $0x68] ss:$16 sps:$4 sm:$0xff]   ;;  %v2108_v27 = vld [vmem:[#allocation2 + $0x8c] ss:$16 sps:$4 sm:$0xff]  }
  0xd0   :  { %v2093_v18 = vld [vmem:[%s3147_s0] sm:$0xff]   ;;  %v2106_v28 = vld [vmem:[#allocation2 + $0x88] ss:$16 sps:$4 sm:$0xff]   ;;  %v2111_v29 = vld [vmem:[#allocation2 + $0xac] ss:$16 sps:$4 sm:$0xff]   ;;  %v224_v58 = vshrl.u32 %v223_v55, 7 }
  0xd1   :  { %420 = vmatpush1.bf16.msra.mxu1 %v2077_v6  ;;  %v2109_v30 = vld [vmem:[#allocation2 + $0xa8] ss:$16 sps:$4 sm:$0xff]   ;;  %v2115_v31 = vld [vmem:[#allocation2 + $0xcc] ss:$16 sps:$4 sm:$0xff]   ;;  %v221_v61 = vld [vmem:[#allocation5] sm:$0xf] }
  0xd2   :  { %421 = vmatprep.subr.bf16.mxu1 %v2078_v7  ;;  %v2113_v32 = vld [vmem:[#allocation2 + $0xc8] ss:$16 sps:$4 sm:$0xff]   ;;  %v2118_v33 = vld [vmem:[#allocation2 + $0xec] ss:$16 sps:$4 sm:$0xff]   ;;  %v2798_v59 = vsub.s32 0, %v224_v58  ;;  %v2800_v60 = vsub.s32 1, %v224_v58 }
  0xd3   :  { %v2116_v34 = vld [vmem:[#allocation2 + $0xe8] ss:$16 sps:$4 sm:$0xff]   ;;  %v2121_v36 = vld [vmem:[#allocation10] ss:$8 sps:$4 sm:$0xff]   ;;  %v2124_v38 = vld [vmem:[#allocation10 + $0x10] ss:$8 sps:$4 sm:$0xff]  }
  0xd4   :  { %v2119_v35 = vld [vmem:[#allocation10 + $0x4] ss:$8 sps:$4 sm:$0xff]   ;;  %v2122_v37 = vld [vmem:[#allocation10 + $0x14] ss:$8 sps:$4 sm:$0xff]   ;;  %v2127_v40 = vld [vmem:[#allocation10 + $0x20] ss:$8 sps:$4 sm:$0xff]   ;;  %v226_v62 = vrot.slane %v221_v61, %v2798_v59  ;;  %v230_v63 = vrot.slane %v221_v61, %v2800_v60 }
  0xd5   :  { %422 = vmatpush1.bf16.msra.mxu1 %v2080_v8  ;;  %1150 = vmatprep.subr.bf16.mxu0 %v2119_v35  ;;  %v2125_v39 = vld [vmem:[#allocation10 + $0x24] ss:$8 sps:$4 sm:$0xff]   ;;  %v2128_v41 = vld [vmem:[#allocation10 + $0x34] ss:$8 sps:$4 sm:$0xff]   ;;  %v2130_v42 = vld [vmem:[#allocation10 + $0x30] ss:$8 sps:$4 sm:$0xff]  }
  0xd6   :  { %423 = vmatprep.subr.bf16.mxu1 %v2081_v9  ;;  %1151 = vmatpush1.bf16.msra.mxu0 %v2121_v36  ;;  %v2131_v43 = vld [vmem:[#allocation10 + $0x44] ss:$8 sps:$4 sm:$0xff]   ;;  %v2133_v44 = vld [vmem:[#allocation10 + $0x40] ss:$8 sps:$4 sm:$0xff]   ;;  %v2134_v45 = vld [vmem:[#allocation10 + $0x54] ss:$8 sps:$4 sm:$0xff]  }
  0xd7   :  { %1152 = vmatprep.subr.bf16.mxu0 %v2122_v37  ;;  %v2136_v46 = vld [vmem:[#allocation10 + $0x50] ss:$8 sps:$4 sm:$0xff]   ;;  %v2137_v47 = vld [vmem:[#allocation10 + $0x64] ss:$8 sps:$4 sm:$0xff]   ;;  %v2139_v48 = vld [vmem:[#allocation10 + $0x60] ss:$8 sps:$4 sm:$0xff]  }
  0xd8   :  { %v2810_v3 = vsub.s32 3, %v224_v58  ;;  %s2551_s20 = smov [#allocation20]  }
  0xd9   :  { %424 = vmatpush1.bf16.msra.mxu1 %v2083_v10  ;;  %s1781_s22 = sshll.u32 %s2551_s20, 4  ;;  %s1782_s22 = int_to_ptr.vmem [resolvable:$true] %s1781_s22 }
  0xda   :  { %425 = vmatprep.subr.bf16.mxu1 %v2084_v11  ;;  %1153 = vmatpush1.bf16.msra.mxu0 %v2124_v38  ;;  %v238_v9 = vrot.slane %v221_v61, %v2810_v3  ;;  %s2497_s1 = scalar_lea.vmem %s1782_s22, 512  ;;  %p2502_p5 = scmp.lt.s32.totalorder %s1782_s22, %s1782_s22 }
  0xdb   :  { %1154 = vmatprep.subr.bf16.mxu0 %v2125_v39  ;;  %p2498_p4 = scmp.ne.s32.totalorder %s1782_s22, %s2497_s1  ;;  %p2503_p6 = scmp.lt.s32.totalorder %s2497_s1, %s2497_s1 }
  0xdd   :  { %426 = vmatpush1.bf16.msra.mxu1 %v2086_v12  ;;  %p2504_p7 = por %p2503_p6, %p2502_p5 }
  0xde   :  { %427 = vmatprep.subr.bf16.mxu1 %v2087_v13  ;;  %1155 = vmatpush1.bf16.msra.mxu0 %v2127_v40 }
  0xdf   :  { %1156 = vmatprep.subr.bf16.mxu0 %v2128_v41  ;;  %p2505_p8 = pnand %p2504_p7, %p2498_p4 }
  0xe1   :  { %428 = vmatpush1.bf16.msra.mxu1 %v2089_v14 }
  0xe2   :  { %429 = vmatprep.subr.bf16.mxu1 %v2090_v15  ;;  %1157 = vmatpush1.bf16.msra.mxu0 %v2130_v42 }
  0xe3   :  { %1158 = vmatprep.subr.bf16.mxu0 %v2131_v43 }
  0xe5   :  { %430 = vmatpush1.bf16.msra.mxu1 %v2092_v16 }
  0xe6   :  { %468 = vmatprep.subr.bf16.mxu1 %v2096_v17  ;;  %1159 = vmatpush1.bf16.msra.mxu0 %v2133_v44 }
  0xe7   :  { %1160 = vmatprep.subr.bf16.mxu0 %v2134_v45 }
  0xe8   :  { %448 = vmatmul.mubr.bf16.vlgmr.msra.gmra.mrb[0].mxu1 %v2093_v18 }
  0xe9   :  { %469 = vmatpush1.bf16.msra.mxu1 %v2094_v19  ;;  %457 = vmatprep.mubr.bf16.mxu1 %v2550_v0 }
  0xea   :  { %470 = vmatprep.subr.bf16.mxu1 %v2099_v20  ;;  %1161 = vmatpush1.bf16.msra.mxu0 %v2136_v46 }
  0xeb   :  { %1162 = vmatprep.subr.bf16.mxu0 %v2137_v47 }
  0xed   :  { %471 = vmatpush1.bf16.msra.mxu1 %v2097_v21 }
  0xee   :  { %472 = vmatprep.subr.bf16.mxu1 %v2102_v22  ;;  %1163 = vmatpush1.bf16.msra.mxu0 %v2139_v48 }
  0xf0   :  { %458 = vmatmul.mubr.bf16.gmra.mrb[4].mxu1 %v2112_v23 }
  0xf1   :  { %473 = vmatpush1.bf16.msra.mxu1 %v2100_v24  ;;  %500 = vmatprep.mubr.bf16.mxu1 %v2550_v0 }
  0xf2   :  { %474 = vmatprep.subr.bf16.mxu1 %v2105_v25 }
  0xf5   :  { %475 = vmatpush1.bf16.msra.mxu1 %v2103_v26 }
  0xf6   :  { %476 = vmatprep.subr.bf16.mxu1 %v2108_v27 }
  0xf9   :  { %477 = vmatpush1.bf16.msra.mxu1 %v2106_v28 }
  0xfa   :  { %478 = vmatprep.subr.bf16.mxu1 %v2111_v29 }
  0xfd   :  { %479 = vmatpush1.bf16.msra.mxu1 %v2109_v30 }
  0xfe   :  { %480 = vmatprep.subr.bf16.mxu1 %v2115_v31 }
 0x101   :  { %481 = vmatpush1.bf16.msra.mxu1 %v2113_v32 }
 0x102   :  { %482 = vmatprep.subr.bf16.mxu1 %v2118_v33 }
 0x105   :  { %483 = vmatpush1.bf16.msra.mxu1 %v2116_v34 }
 0x108   :  { %501 = vmatmul.mubr.bf16.vlgmr.msra.gmra.mrb[8].mxu1 %v2093_v18 }
 0x109   :  { %510 = vmatprep.mubr.bf16.mxu1 %v2550_v0  ;;  %v2804_v0 = vsub.s32 2, %v224_v58 }
 0x10b   :  { %v234_v6 = vrot.slane %v221_v61, %v2804_v0 }
 0x110   :  { %511 = vmatmul.mubr.bf16.gmra.mrb[12].mxu1 %v2112_v23 }
 0x1bb   :  { %v449_v49 = vpop.f32.mrb[0].mxu1 }
 0x1bc   :  { %v451_v50 = vpop.f32.mrb[1].mxu1  ;;  %v2806_v1 = vadd.f32 %v449_v49, %v226_v62 }
 0x1bd   :  { %v453_v51 = vpop.f32.mrb[2].mxu1  ;;  %v2808_v2 = vadd.f32 %v451_v50, %v230_v63 }
 0x1be   :  { %v455_v52 = vpop.f32.mrb[3].mxu1  ;;  %v2812_v4 = vadd.f32 %v453_v51, %v226_v62  ;;  %v548_v7 = vmul.f32 %v2806_v1, %v2806_v1 }
 0x1bf   :  { %v2814_v5 = vadd.f32 %v455_v52, %v230_v63  ;;  %v549_v8 = vmul.f32 %v2808_v2, %v2808_v2  ;;  %v523_v16 = vadd.f32 %v2808_v2, %v2806_v1 }
 0x1c0   :  { %v552_v10 = vmul.f32 %v2812_v4, %v2812_v4 }
 0x1c1   :  { %v553_v11 = vmul.f32 %v2814_v5, %v2814_v5  ;;  %v528_v13 = vadd.f32 %v2814_v5, %v2812_v4  ;;  %v564_v21 = vadd.f32 %v549_v8, %v548_v7 }
 0x1c3   :  { %v459_v53 = vpop.f32.mrb[4].mxu1  ;;  %v569_v26 = vadd.f32 %v553_v11, %v552_v10 }
 0x1c4   :  { %v461_v54 = vpop.f32.mrb[5].mxu1  ;;  %v2832_v17 = vadd.f32 %v459_v53, %v226_v62 }
 0x1c5   :  { %v463_v56 = vpop.f32.mrb[6].mxu1  ;;  %v2834_v18 = vadd.f32 %v461_v54, %v230_v63 }
 0x1c6   :  { %v465_v57 = vpop.f32.mrb[7].mxu1  ;;  %v2843_v27 = vadd.f32 %v463_v56, %v226_v62  ;;  %v556_v35 = vmul.f32 %v2832_v17, %v2832_v17 }
 0x1c7   :  { %v2845_v28 = vadd.f32 %v465_v57, %v230_v63  ;;  %v557_v36 = vmul.f32 %v2834_v18, %v2834_v18  ;;  %v533_v43 = vadd.f32 %v2834_v18, %v2832_v17 }
 0x1c8   :  { %v560_v40 = vmul.f32 %v2843_v27, %v2843_v27 }
 0x1c9   :  { %v561_v41 = vmul.f32 %v2845_v28, %v2845_v28  ;;  %v538_v47 = vadd.f32 %v2845_v28, %v2843_v27  ;;  %v574_v50 = vadd.f32 %v557_v36, %v556_v35  ;;  %v2163_v35 = vld [vmem:[#allocation10 + $0xe0] ss:$8 sps:$4 sm:$0xff]   ;;  %v2164_v36 = vld [vmem:[#allocation10 + $0xf4] ss:$8 sps:$4 sm:$0xff]  }
 0x1cb   :  { %v579_v58 = vadd.f32 %v561_v41, %v560_v40 }
 0x1db   :  { %v502_v12 = vpop.f32.mrb[8].mxu1 }
 0x1dc   :  { %v2828_v14 = vadd.f32 %v502_v12, %v234_v6  ;;  %v504_v15 = vpop.f32.mrb[9].mxu1  ;;  %v2140_v12 = vld [vmem:[#allocation10 + $0x74] ss:$8 sps:$4 sm:$0xff]  }
 0x1dd   :  { %v2836_v19 = vadd.f32 %v504_v15, %v238_v9  ;;  %v506_v20 = vpop.f32.mrb[10].mxu1  ;;  %1164 = vmatprep.subr.bf16.mxu0 %v2140_v12  ;;  %v2143_v15 = vld [vmem:[#allocation10 + $0x84] ss:$8 sps:$4 sm:$0xff]  }
 0x1de   :  { %v2838_v22 = vadd.f32 %v506_v20, %v234_v6  ;;  %v508_v23 = vpop.f32.mrb[11].mxu1  ;;  %v524_v24 = vadd.f32 %v523_v16, %v2828_v14  ;;  %v550_v25 = vmul.f32 %v2828_v14, %v2828_v14  ;;  %v2145_v16 = vld [vmem:[#allocation10 + $0x80] ss:$8 sps:$4 sm:$0xff]   ;;  %v2146_v20 = vld [vmem:[#allocation10 + $0x94] ss:$8 sps:$4 sm:$0xff]  }
 0x1df   :  { %v2847_v29 = vadd.f32 %v508_v23, %v238_v9  ;;  %v551_v30 = vmul.f32 %v2836_v19, %v2836_v19  ;;  %v2149_v23 = vld [vmem:[#allocation10 + $0xa4] ss:$8 sps:$4 sm:$0xff]  }
 0x1e0   :  { %v554_v31 = vmul.f32 %v2838_v22, %v2838_v22  ;;  %v525_v32 = vadd.f32 %v524_v24, %v2836_v19  ;;  %v565_v33 = vadd.f32 %v564_v21, %v550_v25  ;;  %v529_v34 = vadd.f32 %v528_v13, %v2838_v22  ;;  %v2142_v13 = vld [vmem:[#allocation10 + $0x70] ss:$8 sps:$4 sm:$0xff]   ;;  %v2151_v24 = vld [vmem:[#allocation10 + $0xa0] ss:$8 sps:$4 sm:$0xff]   ;;  %v2152_v25 = vld [vmem:[#allocation10 + $0xb4] ss:$8 sps:$4 sm:$0xff]  }
 0x1e1   :  { %v555_v38 = vmul.f32 %v2847_v29, %v2847_v29  ;;  %1165 = vmatpush1.bf16.msra.mxu0 %v2142_v13  ;;  %v2148_v21 = vld [vmem:[#allocation10 + $0x90] ss:$8 sps:$4 sm:$0xff]  }
 0x1e2   :  { %526 = vadd.xlane.f32.xlu0 %v525_v32  ;;  %v566_v37 = vadd.f32 %v565_v33, %v551_v30  ;;  %v570_v39 = vadd.f32 %v569_v26, %v554_v31  ;;  %v530_v46 = vadd.f32 %v529_v34, %v2847_v29  ;;  %1166 = vmatprep.subr.bf16.mxu0 %v2143_v15  ;;  %v2154_v26 = vld [vmem:[#allocation10 + $0xb0] ss:$8 sps:$4 sm:$0xff]   ;;  %v2155_v30 = vld [vmem:[#allocation10 + $0xc4] ss:$8 sps:$4 sm:$0xff]   ;;  %v2157_v31 = vld [vmem:[#allocation10 + $0xc0] ss:$8 sps:$4 sm:$0xff]  }
 0x1e3   :  { %v512_v42 = vpop.f32.mrb[12].mxu1  ;;  %v2158_v32 = vld [vmem:[#allocation10 + $0xd4] ss:$8 sps:$4 sm:$0xff]   ;;  %v2160_v33 = vld [vmem:[#allocation10 + $0xd0] ss:$8 sps:$4 sm:$0xff]  }
 0x1e4   :  { %v2867_v44 = vadd.f32 %v512_v42, %v234_v6  ;;  %v514_v45 = vpop.f32.mrb[13].mxu1  ;;  %567 = vadd.xlane.f32.xlu1 %v566_v37  ;;  %v571_v54 = vadd.f32 %v570_v39, %v555_v38  ;;  %v2161_v34 = vld [vmem:[#allocation10 + $0xe4] ss:$8 sps:$4 sm:$0xff]   ;;  %v2166_v37 = vld [vmem:[#allocation10 + $0xf0] ss:$8 sps:$4 sm:$0xff]  }
 0x1e5   :  { %v2872_v48 = vadd.f32 %v514_v45, %v238_v9  ;;  %v516_v49 = vpop.f32.mrb[14].mxu1  ;;  %1167 = vmatpush1.bf16.msra.mxu0 %v2145_v16  ;;  %v2169_v38 = vld [vmem:[#allocation10 + $0x104] ss:$8 sps:$4 sm:$0xff]  }
 0x1e6   :  { %v558_v51 = vmul.f32 %v2867_v44, %v2867_v44  ;;  %v2876_v52 = vadd.f32 %v516_v49, %v234_v6  ;;  %531 = vadd.xlane.f32.xlu0 %v530_v46  ;;  %v518_v53 = vpop.f32.mrb[15].mxu1  ;;  %v534_v55 = vadd.f32 %v533_v43, %v2867_v44  ;;  %1168 = vmatprep.subr.bf16.mxu0 %v2146_v20 }
 0x1e7   :  { %v2879_v56 = vadd.f32 %v518_v53, %v238_v9  ;;  %v559_v57 = vmul.f32 %v2872_v48, %v2872_v48 }
 0x1e8   :  { %v562_v61 = vmul.f32 %v2876_v52, %v2876_v52  ;;  %572 = vadd.xlane.f32.xlu1 %v571_v54  ;;  %v535_v62 = vadd.f32 %v534_v55, %v2872_v48  ;;  %v539_v63 = vadd.f32 %v538_v47, %v2876_v52  ;;  %v575_v6 = vadd.f32 %v574_v50, %v558_v51 }
 0x1e9   :  { %v563_v8 = vmul.f32 %v2879_v56, %v2879_v56  ;;  %1169 = vmatpush1.bf16.msra.mxu0 %v2148_v21  ;;  %v522_v21 = vld [vmem:[#allocation8] sm:$0xf] }
 0x1ea   :  { %536 = vadd.xlane.f32.xlu0 %v535_v62  ;;  %v540_v7 = vadd.f32 %v539_v63, %v2879_v56  ;;  %v580_v9 = vadd.f32 %v579_v58, %v562_v61  ;;  %v576_v10 = vadd.f32 %v575_v6, %v559_v57  ;;  %1170 = vmatprep.subr.bf16.mxu0 %v2149_v23 }
 0x1ec   :  { %541 = vadd.xlane.f32.xlu1 %v540_v7  ;;  %v581_v11 = vadd.f32 %v580_v9, %v563_v8 }
 0x1ed   :  { %1171 = vmatpush1.bf16.msra.mxu0 %v2151_v24 }
 0x1ee   :  { %577 = vadd.xlane.f32.xlu0 %v576_v10  ;;  %1172 = vmatprep.subr.bf16.mxu0 %v2152_v25 }
 0x1f0   :  { %582 = vadd.xlane.f32.xlu1 %v581_v11  ;;  %v521_v11 = vld [vmem:[#allocation7] sm:$0xf] }
 0x1f1   :  { %1173 = vmatpush1.bf16.msra.mxu0 %v2154_v26  ;;  %v2903_v23 = vrot.slane %v521_v11, %v2804_v0  ;;  %v2906_v24 = vrot.slane %v521_v11, %v2810_v3 }
 0x1f2   :  { %1174 = vmatprep.subr.bf16.mxu0 %v2155_v30  ;;  %v2909_v30 = vrot.slane %v521_v11, %v2800_v60 }
 0x1f5   :  { %1175 = vmatpush1.bf16.msra.mxu0 %v2157_v31 }
 0x1f6   :  { %1176 = vmatprep.subr.bf16.mxu0 %v2158_v32  ;;  %v2913_v32 = vrot.slane %v522_v21, %v2800_v60 }
 0x1f9   :  { %1177 = vmatpush1.bf16.msra.mxu0 %v2160_v33  ;;  %v2916_v33 = vrot.slane %v522_v21, %v2804_v0  ;;  %v2930_v0 = vrot.slane %v522_v21, %v2810_v3 }
 0x1fa   :  { %1178 = vmatprep.subr.bf16.mxu0 %v2161_v34  ;;  %v2919_v34 = vrot.slane %v521_v11, %v2798_v59 }
 0x1fd   :  { %1179 = vmatpush1.bf16.msra.mxu0 %v2163_v35 }
 0x1fe   :  { %1180 = vmatprep.subr.bf16.mxu0 %v2164_v36 }
 0x201   :  { %1181 = vmatpush1.bf16.msra.mxu0 %v2166_v37 }
 0x202   :  { %1203 = vmatprep.subr.bf16.mxu0 %v2169_v38 }
 0x26f   :  { %v527_v39 = vpop.xlane.xlu0 %526 }
 0x270   :  { %v544_v40 = vmul.f32 0.001953125, %v527_v39 }
 0x271   :  { %v568_v41 = vpop.xlane.xlu1 %567 }
 0x272   :  { %v584_v42 = vmul.f32 0.001953125, %v568_v41  ;;  %v588_v43 = vmul.f32 %v544_v40, %v544_v40  ;;  %v600_v31 = vsub.f32 %v2806_v1, %v544_v40  ;;  %v603_v35 = vsub.f32 %v2836_v19, %v544_v40 }
 0x273   :  { %v532_v45 = vpop.xlane.xlu0 %531  ;;  %v601_v37 = vsub.f32 %v2808_v2, %v544_v40  ;;  %v602_v39 = vsub.f32 %v2828_v14, %v544_v40  ;;  %v2927_v41 = vrot.slane %v522_v21, %v2798_v59 }
 0x274   :  { %v2890_v46 = vmul.f32 0.001953125, %v532_v45  ;;  %v592_v47 = vsub.f32 %v584_v42, %v588_v43 }
 0x275   :  { %v573_v49 = vpop.xlane.xlu1 %572 }
 0x276   :  { %v585_v50 = vmul.f32 0.001953125, %v573_v49  ;;  %v596_v51 = vmax.f32 %v592_v47, 0.0  ;;  %v589_v53 = vmul.f32 %v2890_v46, %v2890_v46  ;;  %v604_v1 = vsub.f32 %v2812_v4, %v2890_v46 }
 0x277   :  { %v537_v54 = vpop.xlane.xlu0 %536  ;;  %v606_v45 = vsub.f32 %v2838_v22, %v2890_v46  ;;  %v607_v2 = vsub.f32 %v2847_v29, %v2890_v46  ;;  %v605_v14 = vsub.f32 %v2814_v5, %v2890_v46 }
 0x278   :  { %v2894_v55 = vmul.f32 0.001953125, %v537_v54  ;;  %v616_v57 = vadd.f32 1e-05, %v596_v51  ;;  %v593_v58 = vsub.f32 %v585_v50, %v589_v53 }
 0x279   :  { %v542_v61 = vpop.xlane.xlu1 %541 }
 0x27a   :  { %2231 = vrsqrt.f32 %v616_v57  ;;  %v597_v62 = vmax.f32 %v593_v58, 0.0  ;;  %v2896_v63 = vmul.f32 0.001953125, %v542_v61  ;;  %v590_v7 = vmul.f32 %v2894_v55, %v2894_v55 }
 0x27b   :  { %v578_v6 = vpop.xlane.xlu0 %577  ;;  %v608_v40 = vsub.f32 %v2832_v17, %v2894_v55  ;;  %v609_v3 = vsub.f32 %v2834_v18, %v2894_v55  ;;  %v610_v22 = vsub.f32 %v2867_v44, %v2894_v55  ;;  %v611_v29 = vsub.f32 %v2872_v48, %v2894_v55  ;;  %v2173_v55 = vld [vmem:[#allocation10 + $0x120] ss:$8 sps:$4 sm:$0xff]  }
 0x27c   :  { %v586_v8 = vmul.f32 0.001953125, %v578_v6  ;;  %v617_v9 = vadd.f32 1e-05, %v597_v62  ;;  %v591_v13 = vmul.f32 %v2896_v63, %v2896_v63  ;;  %v612_v54 = vsub.f32 %v2843_v27, %v2896_v63 }
 0x27d   :  { %v583_v10 = vpop.xlane.xlu1 %582 }
 0x27e   :  { %v594_v12 = vsub.f32 %v586_v8, %v590_v7  ;;  %v587_v15 = vmul.f32 0.001953125, %v583_v10  ;;  %2233 = vrsqrt.f32 %v617_v9  ;;  %v613_v8 = vsub.f32 %v2845_v28, %v2896_v63 }
 0x27f   :  { %v615_v9 = vsub.f32 %v2879_v56, %v2896_v63 }
 0x280   :  { %v598_v16 = vmax.f32 %v594_v12, 0.0  ;;  %v595_v20 = vsub.f32 %v587_v15, %v591_v13 }
 0x282   :  { %v618_v25 = vadd.f32 1e-05, %v598_v16  ;;  %v599_v26 = vmax.f32 %v595_v20, 0.0 }
 0x284   :  { %2235 = vrsqrt.f32 %v618_v25  ;;  %v619_v36 = vadd.f32 1e-05, %v599_v26  ;;  %v2232_v38 = vpop.eup %2231 }
 0x285   :  { %v625_v42 = vmul.f32 %v2232_v38, %v601_v37  ;;  %v624_v43 = vmul.f32 %v2232_v38, %v600_v31  ;;  %v627_v19 = vmul.f32 %v2232_v38, %v603_v35  ;;  %v626_v4 = vmul.f32 %v2232_v38, %v602_v39 }
 0x286   :  { %2237 = vrsqrt.f32 %v619_v36 }
 0x287   :  { %v662_v47 = vmul.f32 %v2909_v30, %v625_v42  ;;  %v661_v49 = vmul.f32 %v2919_v34, %v624_v43  ;;  %v664_v5 = vmul.f32 %v2906_v24, %v627_v19  ;;  %v663_v46 = vmul.f32 %v2903_v23, %v626_v4 }
 0x288   :  { %v2234_v50 = vpop.eup %2233 }
 0x289   :  { %v629_v51 = vmul.f32 %v2234_v50, %v605_v14  ;;  %v699_v17 = vadd.f32 %v2913_v32, %v662_v47  ;;  %v628_v53 = vmul.f32 %v2234_v50, %v604_v1  ;;  %v698_v18 = vadd.f32 %v2927_v41, %v661_v49  ;;  %v2167_v47 = vld [vmem:[#allocation10 + $0x100] ss:$8 sps:$4 sm:$0xff]  }
 0x28a   :  { %v631_v57 = vmul.f32 %v2234_v50, %v607_v2  ;;  %v630_v58 = vmul.f32 %v2234_v50, %v606_v45  ;;  %v700_v61 = vadd.f32 %v2916_v33, %v663_v46  ;;  %v2966_v15 = vadd.f32 %v2930_v0, %v664_v5  ;;  %v2172_v46 = vld [vmem:[#allocation10 + $0x114] ss:$8 sps:$4 sm:$0xff]  }
 0x28b   :  { %v666_v62 = vmul.f32 %v2909_v30, %v629_v51  ;;  %v715_v48 = vmul.f32 0.2, %v699_v17  ;;  %v665_v6 = vmul.f32 %v2919_v34, %v628_v53  ;;  %v714_v7 = vmul.f32 0.2, %v698_v18 }
 0x28c   :  { %v668_v10 = vmul.f32 %v2906_v24, %v631_v57  ;;  %v667_v27 = vmul.f32 %v2903_v23, %v630_v58  ;;  %v716_v16 = vmul.f32 0.2, %v700_v61 }
 0x28d   :  { %v703_v12 = vadd.f32 %v2913_v32, %v666_v62  ;;  %v702_v13 = vadd.f32 %v2927_v41, %v665_v6  ;;  %v731_v20 = vmax.f32 %v699_v17, %v715_v48  ;;  %v730_v35 = vmax.f32 %v698_v18, %v714_v7 }
 0x28e   :  { %v2236_v11 = vpop.eup %2235  ;;  %v2969_v28 = vadd.f32 %v2930_v0, %v668_v10  ;;  %v704_v36 = vadd.f32 %v2916_v33, %v667_v27  ;;  %v732_v50 = vmax.f32 %v700_v61, %v716_v16  ;;  %v717_v61 = vmul.f32 0.2, %v2966_v15 }
 0x28f   :  { %v633_v21 = vmul.f32 %v2236_v11, %v609_v3  ;;  %v632_v25 = vmul.f32 %v2236_v11, %v608_v40  ;;  %v719_v26 = vmul.f32 0.2, %v703_v12  ;;  %v718_v31 = vmul.f32 0.2, %v702_v13 }
 0x290   :  { %v2238_v56 = vpop.eup %2237  ;;  %v721_v19 = vmul.f32 0.2, %v2969_v28  ;;  %v720_v45 = vmul.f32 0.2, %v704_v36  ;;  %v733_v44 = vmax.f32 %v2966_v15, %v717_v61  ;;  %v2176_v15 = vld [vmem:[#allocation10 + $0x130] ss:$8 sps:$4 sm:$0xff]  }
 0x291   :  { %v637_v37 = vmul.f32 %v2238_v56, %v613_v8  ;;  %v670_v38 = vmul.f32 %v2909_v30, %v633_v21  ;;  %v636_v39 = vmul.f32 %v2238_v56, %v612_v54  ;;  %v669_v1 = vmul.f32 %v2919_v34, %v632_v25  ;;  %v2175_v8 = vld [vmem:[#allocation10 + $0x124] ss:$8 sps:$4 sm:$0xff]  }
 0x292   :  { %v735_v42 = vmax.f32 %v703_v12, %v719_v26  ;;  %v734_v43 = vmax.f32 %v702_v13, %v718_v31  ;;  %v736_v5 = vmax.f32 %v704_v36, %v720_v45  ;;  %v639_v57 = vmul.f32 %v2238_v56, %v615_v9  ;;  %v2190_v45 = vld [vmem:[#allocation10 + $0x174] ss:$8 sps:$4 sm:$0xff]  }
 0x293   :  { %v674_v2 = vmul.f32 %v2909_v30, %v637_v37  ;;  %v707_v14 = vadd.f32 %v2913_v32, %v670_v38  ;;  %v673_v4 = vmul.f32 %v2919_v34, %v636_v39  ;;  %v706_v40 = vadd.f32 %v2927_v41, %v669_v1  ;;  %v2181_v38 = vld [vmem:[#allocation10 + $0x144] ss:$8 sps:$4 sm:$0xff]   ;;  %v2184_v1 = vld [vmem:[#allocation10 + $0x154] ss:$8 sps:$4 sm:$0xff]  }
 0x294   :  { %v747_v3 = vpack.c.bf16 %v735_v42, %v731_v20  ;;  %v746_v49 = vpack.c.bf16 %v734_v43, %v730_v35  ;;  %v614_v30 = vsub.f32 %v2876_v52, %v2896_v63  ;;  %v2983_v54 = vpack.c.bf16 %v736_v5, %v732_v50  ;;  %v2182_v42 = vld [vmem:[#allocation10 + $0x150] ss:$8 sps:$4 sm:$0xff]   ;;  %v2187_v43 = vld [vmem:[#allocation10 + $0x164] ss:$8 sps:$4 sm:$0xff]   ;;  %v2202_v50 = vld [vmem:[#allocation10 + $0x1b4] ss:$8 sps:$4 sm:$0xff]  }
 0x295   :  { %v711_v51 = vadd.f32 %v2913_v32, %v674_v2  ;;  %v723_v17 = vmul.f32 0.2, %v707_v14  ;;  %v710_v53 = vadd.f32 %v2927_v41, %v673_v4  ;;  %v722_v18 = vmul.f32 0.2, %v706_v40  ;;  %v2170_v32 = vld [vmem:[#allocation10 + $0x110] ss:$8 sps:$4 sm:$0xff]  }
 0x296   :  { %1182 = vmatprep.mubr.bf16.mxu0 %v747_v3  ;;  %v635_v34 = vmul.f32 %v2236_v11, %v611_v29  ;;  %v737_v48 = vmax.f32 %v2969_v28, %v721_v19  ;;  %v676_v6 = vmul.f32 %v2906_v24, %v639_v57  ;;  %v634_v52 = vmul.f32 %v2236_v11, %v610_v22  ;;  %v2185_v19 = vld [vmem:[#allocation10 + $0x160] ss:$8 sps:$4 sm:$0xff]   ;;  %v2188_v2 = vld [vmem:[#allocation10 + $0x170] ss:$8 sps:$4 sm:$0xff]  }
 0x297   :  { %1183 = vmatmul.mubr.bf16.vlgmr.msra.gmra.mrb[0].mxu0 %v746_v49  ;;  %v727_v58 = vmul.f32 0.2, %v711_v51  ;;  %v726_v62 = vmul.f32 0.2, %v710_v53  ;;  %v638_v63 = vmul.f32 %v2238_v56, %v614_v30  ;;  %v739_v29 = vmax.f32 %v707_v14, %v723_v17  ;;  %v2193_v14 = vld [vmem:[#allocation10 + $0x184] ss:$8 sps:$4 sm:$0xff]  }
 0x298   :  { %1204 = vmatpush1.bf16.msra.mxu0 %v2167_v47  ;;  %v672_v41 = vmul.f32 %v2906_v24, %v635_v34  ;;  %v738_v9 = vmax.f32 %v706_v40, %v722_v18  ;;  %v713_v12 = vadd.f32 %v2930_v0, %v676_v6  ;;  %v671_v13 = vmul.f32 %v2903_v23, %v634_v52  ;;  %v2191_v4 = vld [vmem:[#allocation10 + $0x180] ss:$8 sps:$4 sm:$0xff]   ;;  %v2196_v40 = vld [vmem:[#allocation10 + $0x194] ss:$8 sps:$4 sm:$0xff]   ;;  %v2194_v3 = vld [vmem:[#allocation10 + $0x190] ss:$8 sps:$4 sm:$0xff]  }
 0x299   :  { %1205 = vmatprep.subr.bf16.mxu0 %v2172_v46  ;;  %v743_v7 = vmax.f32 %v711_v51, %v727_v58  ;;  %v742_v10 = vmax.f32 %v710_v53, %v726_v62  ;;  %v675_v16 = vmul.f32 %v2903_v23, %v638_v63  ;;  %v749_v28 = vpack.c.bf16 %v737_v48, %v733_v44  ;;  %v2199_v47 = vld [vmem:[#allocation10 + $0x1a4] ss:$8 sps:$4 sm:$0xff]   ;;  %v2197_v49 = vld [vmem:[#allocation10 + $0x1a0] ss:$8 sps:$4 sm:$0xff]   ;;  %v2200_v5 = vld [vmem:[#allocation10 + $0x1b0] ss:$8 sps:$4 sm:$0xff]  }
 0x29a   :  { %v709_v27 = vadd.f32 %v2930_v0, %v672_v41  ;;  %v729_v11 = vmul.f32 0.2, %v713_v12  ;;  %v708_v21 = vadd.f32 %v2916_v33, %v671_v13  ;;  %v2178_v0 = vld [vmem:[#allocation10 + $0x134] ss:$8 sps:$4 sm:$0xff]   ;;  %v2205_v46 = vld [vmem:[#allocation10 + $0x1c4] ss:$8 sps:$4 sm:$0xff]  }
 0x29b   :  { %v751_v24 = vpack.c.bf16 %v743_v7, %v739_v29  ;;  %v750_v20 = vpack.c.bf16 %v742_v10, %v738_v9  ;;  %v712_v25 = vadd.f32 %v2916_v33, %v675_v16  ;;  %v2179_v33 = vld [vmem:[#allocation10 + $0x140] ss:$8 sps:$4 sm:$0xff]   ;;  %v2208_v17 = vld [vmem:[#allocation10 + $0x1d4] ss:$8 sps:$4 sm:$0xff]   ;;  %v2206_v53 = vld [vmem:[#allocation10 + $0x1d0] ss:$8 sps:$4 sm:$0xff]  }
 0x29c   :  { %1206 = vmatpush1.bf16.msra.mxu0 %v2170_v32  ;;  %v725_v22 = vmul.f32 0.2, %v709_v27  ;;  %v745_v26 = vmax.f32 %v713_v12, %v729_v11  ;;  %v724_v31 = vmul.f32 0.2, %v708_v21  ;;  %v2203_v51 = vld [vmem:[#allocation10 + $0x1c0] ss:$8 sps:$4 sm:$0xff]  }
 0x29d   :  { %1192 = vmatprep.mubr.bf16.mxu0 %v751_v24  ;;  %1207 = vmatprep.subr.bf16.mxu0 %v2175_v8  ;;  %v728_v23 = vmul.f32 0.2, %v712_v25  ;;  %v2211_v18 = vld [vmem:[#allocation10 + $0x1e4] ss:$8 sps:$4 sm:$0xff]   ;;  %v2209_v30 = vld [vmem:[#allocation10 + $0x1e0] ss:$8 sps:$4 sm:$0xff]  }
 0x29e   :  { %v741_v56 = vmax.f32 %v709_v27, %v725_v22  ;;  %v740_v36 = vmax.f32 %v708_v21, %v724_v31  ;;  %v2214_v34 = vld [vmem:[#allocation10 + $0x1f4] ss:$8 sps:$4 sm:$0xff]   ;;  %v2212_v57 = vld [vmem:[#allocation10 + $0x1f0] ss:$8 sps:$4 sm:$0xff]  }
 0x29f   :  { %1193 = vmatmul.mubr.bf16.gmra.mrb[4].mxu0 %v750_v20  ;;  %v744_v37 = vmax.f32 %v712_v25, %v728_v23  ;;  %v818_v58 = vld [vmem:[%s3153_s6] sm:$0x3] }
 0x2a0   :  { %1208 = vmatpush1.bf16.msra.mxu0 %v2173_v55  ;;  %1235 = vmatprep.mubr.bf16.mxu0 %v749_v28  ;;  %v753_v35 = vpack.c.bf16 %v745_v26, %v741_v56  ;;  %v823_v62 = vrot.slane %v818_v58, %v2798_v59  ;;  %v827_v61 = vrot.slane %v818_v58, %v2800_v60 }
 0x2a1   :  { %1209 = vmatprep.subr.bf16.mxu0 %v2178_v0  ;;  %v752_v39 = vpack.c.bf16 %v744_v37, %v740_v36  ;;  %v2215_v36 = vld [vmem:[#allocation14 + $0x40] sm:$0xff]  }
 0x2a2   :  { %v2216_v37 = vld [vmem:[#allocation14] sm:$0xff]   ;;  %1916 = vmatprep.subr.bf16.mxu1 %v2215_v36 }
 0x2a3   :  { %1917 = vmatpush3.bf16.msra.mxu1 %v2216_v37 }
 0x2a4   :  { %1210 = vmatpush1.bf16.msra.mxu0 %v2176_v15 }
 0x2a5   :  { %1211 = vmatprep.subr.bf16.mxu0 %v2181_v38  ;;  %v2217_v38 = vld [vmem:[#allocation14 + $0x48] sm:$0xff]  }
 0x2a6   :  { %1918 = vmatprep.subr.bf16.mxu1 %v2217_v38 }
 0x2a8   :  { %1212 = vmatpush1.bf16.msra.mxu0 %v2179_v33  ;;  %v2219_v33 = vld [vmem:[#allocation14 + $0x50] sm:$0xff]  }
 0x2a9   :  { %1213 = vmatprep.subr.bf16.mxu0 %v2184_v1  ;;  %v2220_v1 = vld [vmem:[#allocation14 + $0x10] sm:$0xff]  }
 0x2ac   :  { %1214 = vmatpush1.bf16.msra.mxu0 %v2182_v42  ;;  %v2221_v42 = vld [vmem:[#allocation14 + $0x58] sm:$0xff]  }
 0x2ad   :  { %1215 = vmatprep.subr.bf16.mxu0 %v2187_v43  ;;  %v2222_v43 = vld [vmem:[#allocation14 + $0x18] sm:$0xff]  }
 0x2b0   :  { %1216 = vmatpush1.bf16.msra.mxu0 %v2185_v19  ;;  %v2223_v19 = vld [vmem:[#allocation14 + $0x60] sm:$0xff]  }
 0x2b1   :  { %1217 = vmatprep.subr.bf16.mxu0 %v2190_v45  ;;  %v2224_v45 = vld [vmem:[#allocation14 + $0x20] sm:$0xff]  }
 0x2b4   :  { %1218 = vmatpush1.bf16.msra.mxu0 %v2188_v2  ;;  %v2225_v2 = vld [vmem:[#allocation14 + $0x68] sm:$0xff]  }
 0x2b5   :  { %1219 = vmatprep.subr.bf16.mxu0 %v2193_v14  ;;  %v2226_v14 = vld [vmem:[#allocation14 + $0x28] sm:$0xff]  }
 0x2b8   :  { %1220 = vmatpush1.bf16.msra.mxu0 %v2191_v4  ;;  %v2227_v4 = vld [vmem:[#allocation14 + $0x70] sm:$0xff]  }
 0x2b9   :  { %1221 = vmatprep.subr.bf16.mxu0 %v2196_v40  ;;  %v2228_v40 = vld [vmem:[#allocation14 + $0x30] sm:$0xff]  }
 0x2bc   :  { %1222 = vmatpush1.bf16.msra.mxu0 %v2194_v3  ;;  %v2229_v3 = vld [vmem:[#allocation14 + $0x78] sm:$0xff]  }
 0x2bd   :  { %1223 = vmatprep.subr.bf16.mxu0 %v2199_v47  ;;  %v2230_v47 = vld [vmem:[#allocation14 + $0x38] sm:$0xff]  }
 0x2c0   :  { %1224 = vmatpush1.bf16.msra.mxu0 %v2197_v49 }
 0x2c1   :  { %1225 = vmatprep.subr.bf16.mxu0 %v2202_v50 }
 0x2c4   :  { %1226 = vmatpush1.bf16.msra.mxu0 %v2200_v5 }
 0x2c5   :  { %1227 = vmatprep.subr.bf16.mxu0 %v2205_v46 }
 0x2c8   :  { %1228 = vmatpush1.bf16.msra.mxu0 %v2203_v51 }
 0x2c9   :  { %1229 = vmatprep.subr.bf16.mxu0 %v2208_v17 }
 0x2cc   :  { %1230 = vmatpush1.bf16.msra.mxu0 %v2206_v53 }
 0x2cd   :  { %1231 = vmatprep.subr.bf16.mxu0 %v2211_v18 }
 0x2d0   :  { %1232 = vmatpush1.bf16.msra.mxu0 %v2209_v30 }
 0x2d1   :  { %1233 = vmatprep.subr.bf16.mxu0 %v2214_v34 }
 0x2d4   :  { %1234 = vmatpush1.bf16.msra.mxu0 %v2212_v57 }
 0x2d7   :  { %1236 = vmatmul.mubr.bf16.vlgmr.msra.gmra.mrb[0].mxu0 %v2983_v54 }
 0x2d8   :  { %1245 = vmatprep.mubr.bf16.mxu0 %v753_v35 }
 0x2df   :  { %1246 = vmatmul.mubr.bf16.gmra.mrb[4].mxu0 %v752_v39  ;;  %v2218_v39 = vld [vmem:[#allocation14 + $0x8] sm:$0xff]  }
 0x2e0   :  { %1919 = vmatpush3.bf16.msra.mxu1 %v2218_v39 }
 0x2e1   :  { %1920 = vmatprep.subr.bf16.mxu1 %v2219_v33 }
 0x2e4   :  { %1921 = vmatpush3.bf16.msra.mxu1 %v2220_v1 }
 0x2e5   :  { %1922 = vmatprep.subr.bf16.mxu1 %v2221_v42 }
 0x2e8   :  { %1923 = vmatpush3.bf16.msra.mxu1 %v2222_v43 }
 0x2e9   :  { %1924 = vmatprep.subr.bf16.mxu1 %v2223_v19 }
 0x2ec   :  { %1925 = vmatpush3.bf16.msra.mxu1 %v2224_v45 }
 0x2ed   :  { %1926 = vmatprep.subr.bf16.mxu1 %v2225_v2 }
 0x2f0   :  { %1927 = vmatpush3.bf16.msra.mxu1 %v2226_v14 }
 0x2f1   :  { %1928 = vmatprep.subr.bf16.mxu1 %v2227_v4 }
 0x2f4   :  { %1929 = vmatpush3.bf16.msra.mxu1 %v2228_v40 }
 0x2f5   :  { %1930 = vmatprep.subr.bf16.mxu1 %v2229_v3 }
 0x2f8   :  { %1931 = vmatpush3.bf16.msra.mxu1 %v2230_v47 }
 0x3aa   :  { %v1237_v48 = vpop.f32.mrb[0].mxu0 }
 0x3ab   :  { %v3005_v32 = vadd.f32 %v1237_v48, %v823_v62  ;;  %v1239_v41 = vpop.f32.mrb[1].mxu0 }
 0x3ac   :  { %v3007_v6 = vadd.f32 %v1239_v41, %v827_v61  ;;  %v1241_v52 = vpop.f32.mrb[2].mxu0 }
 0x3ad   :  { %v3009_v63 = vadd.f32 %v1241_v52, %v823_v62  ;;  %v1243_v54 = vpop.f32.mrb[3].mxu0  ;;  %v1275_v8 = vmul.f32 %v3005_v32, %v3005_v32 }
 0x3ae   :  { %v3011_v29 = vadd.f32 %v1243_v54, %v827_v61  ;;  %v1258_v7 = vadd.f32 %v3007_v6, %v3005_v32  ;;  %v1276_v9 = vmul.f32 %v3007_v6, %v3007_v6 }
 0x3af   :  { %v1277_v27 = vmul.f32 %v3009_v63, %v3009_v63 }
 0x3b0   :  { %1259 = vadd.xlane.f32.xlu0 %v1258_v7  ;;  %v1261_v10 = vadd.f32 %v3011_v29, %v3009_v63  ;;  %v1278_v12 = vmul.f32 %v3011_v29, %v3011_v29  ;;  %v1283_v16 = vadd.f32 %v1276_v9, %v1275_v8 }
 0x3b2   :  { %v1247_v13 = vpop.f32.mrb[4].mxu0  ;;  %1262 = vadd.xlane.f32.xlu1 %v1261_v10  ;;  %v1286_v22 = vadd.f32 %v1278_v12, %v1277_v27 }
 0x3b3   :  { %v3025_v24 = vadd.f32 %v1247_v13, %v823_v62  ;;  %v1249_v20 = vpop.f32.mrb[5].mxu0 }
 0x3b4   :  { %v3027_v44 = vadd.f32 %v1249_v20, %v827_v61  ;;  %v1251_v55 = vpop.f32.mrb[6].mxu0  ;;  %1284 = vadd.xlane.f32.xlu0 %v1283_v16 }
 0x3b5   :  { %v3029_v11 = vadd.f32 %v1251_v55, %v823_v62  ;;  %v1253_v21 = vpop.f32.mrb[7].mxu0  ;;  %v1279_v0 = vmul.f32 %v3025_v24, %v3025_v24 }
 0x3b6   :  { %v3031_v25 = vadd.f32 %v1253_v21, %v827_v61  ;;  %1287 = vadd.xlane.f32.xlu1 %v1286_v22  ;;  %v1264_v28 = vadd.f32 %v3027_v44, %v3025_v24  ;;  %v1280_v56 = vmul.f32 %v3027_v44, %v3027_v44  ;;  %v1256_v21 = vld [vmem:[#allocation11] sm:$0x3] }
 0x3b7   :  { %v1281_v31 = vmul.f32 %v3029_v11, %v3029_v11 }
 0x3b8   :  { %1265 = vadd.xlane.f32.xlu0 %v1264_v28  ;;  %v1267_v26 = vadd.f32 %v3031_v25, %v3029_v11  ;;  %v1282_v23 = vmul.f32 %v3031_v25, %v3031_v25  ;;  %v1289_v15 = vadd.f32 %v1280_v56, %v1279_v0  ;;  %v1257_v56 = vld [vmem:[#allocation13] sm:$0x3] }
 0x3b9   :  { %v1358_v37 = vrot.slane %v1257_v56, %v2798_v59  ;;  %v1362_v38 = vrot.slane %v1257_v56, %v2800_v60 }
 0x3ba   :  { %1268 = vadd.xlane.f32.xlu1 %v1267_v26  ;;  %v1292_v35 = vadd.f32 %v1282_v23, %v1281_v31 }
 0x3bc   :  { %1290 = vadd.xlane.f32.xlu0 %v1289_v15  ;;  %v1339_v15 = vrot.slane %v1256_v21, %v2798_v59 }
 0x3be   :  { %1293 = vadd.xlane.f32.xlu1 %v1292_v35  ;;  %v1343_v35 = vrot.slane %v1256_v21, %v2800_v60 }
 0x43d   :  { %v1260_v49 = vpop.xlane.xlu0 %1259 }
 0x43e   :  { %v1271_v50 = vmul.f32 0.00390625, %v1260_v49 }
 0x43f   :  { %v1263_v5 = vpop.xlane.xlu1 %1262 }
 0x440   :  { %v1272_v46 = vmul.f32 0.00390625, %v1263_v5  ;;  %v1299_v17 = vmul.f32 %v1271_v50, %v1271_v50  ;;  %v1311_v31 = vsub.f32 %v3005_v32, %v1271_v50  ;;  %v1312_v23 = vsub.f32 %v3007_v6, %v1271_v50 }
 0x441   :  { %v1285_v51 = vpop.xlane.xlu0 %1284 }
 0x442   :  { %v1295_v53 = vmul.f32 0.00390625, %v1285_v51  ;;  %v1300_v34 = vmul.f32 %v1272_v46, %v1272_v46  ;;  %v1313_v39 = vsub.f32 %v3009_v63, %v1272_v46  ;;  %v1314_v33 = vsub.f32 %v3011_v29, %v1272_v46 }
 0x443   :  { %v1288_v18 = vpop.xlane.xlu1 %1287 }
 0x444   :  { %v1303_v30 = vsub.f32 %v1295_v53, %v1299_v17  ;;  %v1296_v57 = vmul.f32 0.00390625, %v1288_v18 }
 0x445   :  { %v1266_v58 = vpop.xlane.xlu0 %1265 }
 0x446   :  { %v1307_v62 = vmax.f32 %v1303_v30, 0.0  ;;  %v1304_v61 = vsub.f32 %v1296_v57, %v1300_v34  ;;  %v1273_v48 = vmul.f32 0.00390625, %v1266_v58 }
 0x447   :  { %v1269_v41 = vpop.xlane.xlu1 %1268 }
 0x448   :  { %v1319_v52 = vadd.f32 1e-05, %v1307_v62  ;;  %v1308_v54 = vmax.f32 %v1304_v61, 0.0  ;;  %v1274_v7 = vmul.f32 0.00390625, %v1269_v41  ;;  %v1301_v10 = vmul.f32 %v1273_v48, %v1273_v48 }
 0x449   :  { %v1291_v8 = vpop.xlane.xlu0 %1290  ;;  %v1315_v63 = vsub.f32 %v3025_v24, %v1273_v48  ;;  %v1316_v29 = vsub.f32 %v3027_v44, %v1273_v48 }
 0x44a   :  { %2239 = vrsqrt.f32 %v1319_v52  ;;  %v1320_v9 = vadd.f32 1e-05, %v1308_v54  ;;  %v1297_v27 = vmul.f32 0.00390625, %v1291_v8  ;;  %v1302_v16 = vmul.f32 %v1274_v7, %v1274_v7 }
 0x44b   :  { %v1294_v12 = vpop.xlane.xlu1 %1293  ;;  %v1317_v50 = vsub.f32 %v3029_v11, %v1274_v7  ;;  %v1318_v5 = vsub.f32 %v3031_v25, %v1274_v7 }
 0x44c   :  { %2241 = vrsqrt.f32 %v1320_v9  ;;  %v1305_v13 = vsub.f32 %v1297_v27, %v1301_v10  ;;  %v1298_v20 = vmul.f32 0.00390625, %v1294_v12 }
 0x44e   :  { %v1309_v55 = vmax.f32 %v1305_v13, 0.0  ;;  %v1306_v22 = vsub.f32 %v1298_v20, %v1302_v16 }
 0x450   :  { %v1321_v28 = vadd.f32 1e-05, %v1309_v55  ;;  %v1310_v0 = vmax.f32 %v1306_v22, 0.0 }
 0x452   :  { %2243 = vrsqrt.f32 %v1321_v28  ;;  %v1322_v26 = vadd.f32 1e-05, %v1310_v0  ;;  %v1896_v0 = vld [vmem:[#allocation16] ss:$0 sm:$0xff] }
 0x454   :  { %v2240_v36 = vpop.eup %2239  ;;  %2245 = vrsqrt.f32 %v1322_v26 }
 0x455   :  { %v1327_v1 = vmul.f32 %v2240_v36, %v1311_v31  ;;  %v1328_v42 = vmul.f32 %v2240_v36, %v1312_v23 }
 0x456   :  { %v2242_v43 = vpop.eup %2241 }
 0x457   :  { %v1346_v32 = vmul.f32 %v1339_v15, %v1327_v1  ;;  %v1329_v19 = vmul.f32 %v2242_v43, %v1313_v39  ;;  %v1330_v6 = vmul.f32 %v2242_v43, %v1314_v33  ;;  %v1347_v45 = vmul.f32 %v1343_v35, %v1328_v42 }
 0x459   :  { %v1348_v2 = vmul.f32 %v1339_v15, %v1329_v19  ;;  %v1349_v14 = vmul.f32 %v1343_v35, %v1330_v6  ;;  %v1366_v4 = vadd.f32 %v1362_v38, %v1347_v45  ;;  %v1365_v40 = vadd.f32 %v1358_v37, %v1346_v32 }
 0x45b   :  { %v1368_v3 = vadd.f32 %v1362_v38, %v1349_v14  ;;  %v1374_v47 = vmul.f32 0.2, %v1366_v4  ;;  %v1367_v59 = vadd.f32 %v1358_v37, %v1348_v2  ;;  %v1373_v49 = vmul.f32 0.2, %v1365_v40  ;;  %v1664_v14 = vld [vmem:[%s3160_s13] sm:$0xff] }
 0x45c   :  { %v2244_v60 = vpop.eup %2243 }
 0x45d   :  { %v1376_v46 = vmul.f32 0.2, %v1368_v3  ;;  %v1375_v51 = vmul.f32 0.2, %v1367_v59  ;;  %v1382_v53 = vmax.f32 %v1366_v4, %v1374_v47  ;;  %v1381_v18 = vmax.f32 %v1365_v40, %v1373_v49  ;;  %v1665_v4 = vld [vmem:[%s3160_s13 + $0x8] sm:$0xff]  ;;  %v1667_v47 = vld [vmem:[%s3160_s13 + $0x18] sm:$0xff] }
 0x45e   :  { %v2246_v17 = vpop.eup %2245  ;;  %v1332_v30 = vmul.f32 %v2244_v60, %v1316_v29  ;;  %v1331_v34 = vmul.f32 %v2244_v60, %v1315_v63  ;;  %v2002_v40 = vpack.c.bf16 %v1665_v4, %v1664_v14  ;;  %v1668_v49 = vld [vmem:[%s3160_s13 + $0x20] sm:$0xff]  ;;  %v1669_v60 = vld [vmem:[%s3160_s13 + $0x28] sm:$0xff]  ;;  %v1670_v29 = vld [vmem:[%s3160_s13 + $0x30] sm:$0xff] }
 0x45f   :  { %v1384_v57 = vmax.f32 %v1368_v3, %v1376_v46  ;;  %v1383_v58 = vmax.f32 %v1367_v59, %v1375_v51  ;;  %v1334_v62 = vmul.f32 %v2246_v17, %v1318_v5  ;;  %v1333_v61 = vmul.f32 %v2246_v17, %v1317_v50  ;;  %v1666_v3 = vld [vmem:[%s3160_s13 + $0x10] sm:$0xff]  ;;  %v1671_v50 = vld [vmem:[%s3160_s13 + $0x38] sm:$0xff]  ;;  %v1672_v46 = vld [vmem:[%s3160_s13 + $0x40] sm:$0xff] }
 0x460   :  { %v1351_v41 = vmul.f32 %v1343_v35, %v1332_v30  ;;  %v1350_v52 = vmul.f32 %v1339_v15, %v1331_v34  ;;  %2003 = vmatprep.subr.bf16.mxu1 %v2002_v40  ;;  %v2006_v59 = vpack.c.bf16 %v1667_v47, %v1666_v3  ;;  %v2010_v63 = vpack.c.bf16 %v1669_v60, %v1668_v49  ;;  %v1673_v51 = vld [vmem:[%s3160_s13 + $0x48] sm:$0xff]  ;;  %v1676_v30 = vld [vmem:[%s3160_s13 + $0x60] sm:$0xff] }
 0x461   :  { %v1390_v24 = vpack.c.bf16 %v1384_v57, %v1382_v53  ;;  %v1389_v54 = vpack.c.bf16 %v1383_v58, %v1381_v18  ;;  %v1353_v44 = vmul.f32 %v1343_v35, %v1334_v62  ;;  %v1352_v48 = vmul.f32 %v1339_v15, %v1333_v61  ;;  %v1674_v53 = vld [vmem:[%s3160_s13 + $0x50] sm:$0xff]  ;;  %v1675_v18 = vld [vmem:[%s3160_s13 + $0x58] sm:$0xff]  ;;  %v1677_v57 = vld [vmem:[%s3160_s13 + $0x68] sm:$0xff] }
 0x462   :  { %v1370_v11 = vadd.f32 %v1362_v38, %v1351_v41  ;;  %v1369_v8 = vadd.f32 %v1358_v37, %v1350_v52  ;;  %v2014_v5 = vpack.c.bf16 %v1671_v50, %v1670_v29  ;;  %v2018_v17 = vpack.c.bf16 %v1673_v51, %v1672_v46  ;;  %v1678_v62 = vld [vmem:[%s3160_s13 + $0x70] sm:$0xff]  ;;  %v1679_v61 = vld [vmem:[%s3160_s13 + $0x78] sm:$0xff] }
 0x463   :  { %1560 = vmatprep.mubr.bf16.mxu1 %v1390_v24  ;;  %v1372_v25 = vadd.f32 %v1362_v38, %v1353_v44  ;;  %v1371_v7 = vadd.f32 %v1358_v37, %v1352_v48  ;;  %v2022_v34 = vpack.c.bf16 %v1675_v18, %v1674_v53  ;;  %v2026_v58 = vpack.c.bf16 %v1677_v57, %v1676_v30 }
 0x464   :  { %1561 = vmatmul.mubr.bf16.vlgmr.msra.gmra.mrb[16].mxu1 %v1389_v54  ;;  %v1378_v9 = vmul.f32 0.2, %v1370_v11  ;;  %v1377_v10 = vmul.f32 0.2, %v1369_v8  ;;  %v2030_v41 = vpack.c.bf16 %v1679_v61, %v1678_v62 }
 0x465   :  { %v1380_v27 = vmul.f32 0.2, %v1372_v25  ;;  %v1379_v12 = vmul.f32 0.2, %v1371_v7  ;;  %2005 = vmatpush3.bf16.msra.mxu1 %v2002_v40  ;;  %v1914_v40 = vld [vmem:[#allocation19] ss:$0 sm:$0xff] }
 0x466   :  { %v1386_v13 = vmax.f32 %v1370_v11, %v1378_v9  ;;  %v1385_v20 = vmax.f32 %v1369_v8, %v1377_v10  ;;  %2007 = vmatprep.subr.bf16.mxu1 %v2006_v59 }
 0x467   :  { %v1388_v16 = vmax.f32 %v1372_v25, %v1380_v27  ;;  %v1387_v55 = vmax.f32 %v1371_v7, %v1379_v12 }
 0x469   :  { %v1392_v22 = vpack.c.bf16 %v1388_v16, %v1386_v13  ;;  %v1391_v21 = vpack.c.bf16 %v1387_v55, %v1385_v20  ;;  %2009 = vmatpush3.bf16.msra.mxu1 %v2006_v59 }
 0x46a   :  { %2011 = vmatprep.subr.bf16.mxu1 %v2010_v63 }
 0x46b   :  { %1568 = vmatprep.mubr.bf16.mxu1 %v1392_v22 }
 0x46c   :  { %1569 = vmatmul.mubr.bf16.gmra.mrb[20].mxu1 %v1391_v21 }
 0x46d   :  { %2013 = vmatpush3.bf16.msra.mxu1 %v2010_v63 }
 0x46e   :  { %2015 = vmatprep.subr.bf16.mxu1 %v2014_v5 }
 0x471   :  { %2017 = vmatpush3.bf16.msra.mxu1 %v2014_v5 }
 0x472   :  { %2019 = vmatprep.subr.bf16.mxu1 %v2018_v17 }
 0x475   :  { %2021 = vmatpush3.bf16.msra.mxu1 %v2018_v17 }
 0x476   :  { %2023 = vmatprep.subr.bf16.mxu1 %v2022_v34 }
 0x479   :  { %2025 = vmatpush3.bf16.msra.mxu1 %v2022_v34 }
 0x47a   :  { %2027 = vmatprep.subr.bf16.mxu1 %v2026_v58 }
 0x47d   :  { %2029 = vmatpush3.bf16.msra.mxu1 %v2026_v58 }
 0x47e   :  { %2031 = vmatprep.subr.bf16.mxu1 %v2030_v41 }
 0x481   :  { %2033 = vmatpush3.bf16.msra.mxu1 %v2030_v41 }
 0x537   :  { %v1932_v28 = vpop.f32.mrb[16].mxu1 }
 0x538   :  { %v1933_v56 = vpop.f32.mrb[17].mxu1 }
 0x539   :  { %v1934_v26 = vadd.f32 %v1933_v56, %v1932_v28  ;;  %v1935_v31 = vpop.f32.mrb[18].mxu1 }
 0x53a   :  { %v1936_v23 = vpop.f32.mrb[19].mxu1 }
 0x53b   :  { %v3057_v15 = vadd.f32 %v1934_v26, %v1896_v0  ;;  %v1937_v35 = vadd.f32 %v1936_v23, %v1935_v31 }
 0x53d   :  { %v3059_v36 = vadd.f32 %v1937_v35, %v1896_v0  ;;  %1579 = vadd.xlane.f32.xlu0 %v3057_v15  ;;  %v1592_v38 = vmul.f32 %v3057_v15, %v3057_v15 }
 0x53f   :  { %1581 = vadd.xlane.f32.xlu1 %v3059_v36  ;;  %v1938_v37 = vpop.f32.mrb[20].mxu1  ;;  %v1593_v42 = vmul.f32 %v3059_v36, %v3059_v36 }
 0x540   :  { %v1939_v39 = vpop.f32.mrb[21].mxu1 }
 0x541   :  { %v1940_v33 = vadd.f32 %v1939_v39, %v1938_v37  ;;  %1596 = vadd.xlane.f32.xlu0 %v1592_v38  ;;  %v1941_v1 = vpop.f32.mrb[22].mxu1 }
 0x542   :  { %v1942_v43 = vpop.f32.mrb[23].mxu1 }
 0x543   :  { %v3067_v32 = vadd.f32 %v1940_v33, %v1896_v0  ;;  %v1943_v19 = vadd.f32 %v1942_v43, %v1941_v1  ;;  %1598 = vadd.xlane.f32.xlu1 %v1593_v42 }
 0x545   :  { %v3069_v6 = vadd.f32 %v1943_v19, %v1896_v0  ;;  %1583 = vadd.xlane.f32.xlu0 %v3067_v32  ;;  %v1594_v45 = vmul.f32 %v3067_v32, %v3067_v32 }
 0x547   :  { %1585 = vadd.xlane.f32.xlu1 %v3069_v6  ;;  %v1595_v2 = vmul.f32 %v3069_v6, %v3069_v6 }
 0x549   :  { %1600 = vadd.xlane.f32.xlu0 %v1594_v45  ;;  %v1913_v45 = vld [vmem:[#allocation17] ss:$0 sm:$0xff] }
 0x54b   :  { %1602 = vadd.xlane.f32.xlu1 %v1595_v2 }
 0x5ca   :  { %v1580_v52 = vpop.xlane.xlu0 %1579 }
 0x5cb   :  { %v1588_v24 = vmul.f32 0.0078125, %v1580_v52 }
 0x5cc   :  { %v1582_v54 = vpop.xlane.xlu1 %1581 }
 0x5cd   :  { %v1589_v44 = vmul.f32 0.0078125, %v1582_v54  ;;  %v1608_v11 = vmul.f32 %v1588_v24, %v1588_v24  ;;  %v1620_v43 = vsub.f32 %v3057_v15, %v1588_v24 }
 0x5ce   :  { %v1597_v48 = vpop.xlane.xlu0 %1596 }
 0x5cf   :  { %v1604_v8 = vmul.f32 0.0078125, %v1597_v48  ;;  %v1609_v7 = vmul.f32 %v1589_v44, %v1589_v44  ;;  %v1621_v2 = vsub.f32 %v3059_v36, %v1589_v44 }
 0x5d0   :  { %v1599_v25 = vpop.xlane.xlu1 %1598 }
 0x5d1   :  { %v1612_v9 = vsub.f32 %v1604_v8, %v1608_v11  ;;  %v1605_v10 = vmul.f32 0.0078125, %v1599_v25 }
 0x5d2   :  { %v1584_v27 = vpop.xlane.xlu0 %1583 }
 0x5d3   :  { %v1616_v12 = vmax.f32 %v1612_v9, 0.0  ;;  %v1613_v13 = vsub.f32 %v1605_v10, %v1609_v7  ;;  %v1590_v16 = vmul.f32 0.0078125, %v1584_v27 }
 0x5d4   :  { %v1586_v20 = vpop.xlane.xlu1 %1585 }
 0x5d5   :  { %v1624_v55 = vadd.f32 1e-05, %v1616_v12  ;;  %v1617_v22 = vmax.f32 %v1613_v13, 0.0  ;;  %v1591_v21 = vmul.f32 0.0078125, %v1586_v20  ;;  %v1610_v56 = vmul.f32 %v1590_v16, %v1590_v16 }
 0x5d6   :  { %v1601_v28 = vpop.xlane.xlu0 %1600  ;;  %v1622_v60 = vsub.f32 %v3067_v32, %v1590_v16 }
 0x5d7   :  { %2247 = vrsqrt.f32 %v1624_v55  ;;  %v1625_v0 = vadd.f32 1e-05, %v1617_v22  ;;  %v1606_v26 = vmul.f32 0.0078125, %v1601_v28  ;;  %v1611_v23 = vmul.f32 %v1591_v21, %v1591_v21 }
 0x5d8   :  { %v1603_v31 = vpop.xlane.xlu1 %1602  ;;  %v1623_v5 = vsub.f32 %v3069_v6, %v1591_v21  ;;  %v1915_v6 = vld [vmem:[%s3161_s14] ss:$0 sm:$0xff] }
 0x5d9   :  { %2249 = vrsqrt.f32 %v1625_v0  ;;  %v1614_v35 = vsub.f32 %v1606_v26, %v1610_v56  ;;  %v1607_v37 = vmul.f32 0.0078125, %v1603_v31 }
 0x5db   :  { %v1618_v38 = vmax.f32 %v1614_v35, 0.0  ;;  %v1615_v39 = vsub.f32 %v1607_v37, %v1611_v23 }
 0x5dd   :  { %v1626_v33 = vadd.f32 1e-05, %v1618_v38  ;;  %v1619_v1 = vmax.f32 %v1615_v39, 0.0 }
 0x5df   :  { %2251 = vrsqrt.f32 %v1626_v33  ;;  %v1627_v42 = vadd.f32 1e-05, %v1619_v1 }
 0x5e1   :  { %v2248_v19 = vpop.eup %2247  ;;  %2253 = vrsqrt.f32 %v1627_v42 }
 0x5e2   :  { %v1632_v14 = vmul.f32 %v2248_v19, %v1620_v43 }
 0x5e3   :  { %v2250_v4 = vpop.eup %2249 }
 0x5e4   :  { %v1633_v3 = vmul.f32 %v2250_v4, %v1621_v2  ;;  %v1642_v47 = vmul.f32 %v1913_v45, %v1632_v14 }
 0x5e6   :  { %v1652_v59 = vadd.f32 %v1914_v40, %v1642_v47  ;;  %v1643_v49 = vmul.f32 %v1913_v45, %v1633_v3 }
 0x5e8   :  { %v1656_v63 = vmul.f32 0.2, %v1652_v59  ;;  %v1653_v29 = vadd.f32 %v1914_v40, %v1643_v49 }
 0x5e9   :  { %v2252_v50 = vpop.eup %2251 }
 0x5ea   :  { %v1660_v15 = vmax.f32 %v1652_v59, %v1656_v63  ;;  %v1657_v46 = vmul.f32 0.2, %v1653_v29  ;;  %v1634_v51 = vmul.f32 %v2252_v50, %v1622_v60 }
 0x5eb   :  { %v2254_v17 = vpop.eup %2253 }
 0x5ec   :  { %1996 = vmatprep.mubr.f32.mxu1 %v1660_v15  ;;  %v1661_v36 = vmax.f32 %v1653_v29, %v1657_v46  ;;  %v1644_v53 = vmul.f32 %v1913_v45, %v1634_v51  ;;  %v1635_v18 = vmul.f32 %v2254_v17, %v1623_v5 }
 0x5ee   :  { %1997 = vmatmul.mubr.f32.vlgmr.msra.gmra.mrb[24].mxu1 %v1661_v36  ;;  %v1654_v30 = vadd.f32 %v1914_v40, %v1644_v53  ;;  %v1645_v34 = vmul.f32 %v1913_v45, %v1635_v18 }
 0x5f0   :  { %v1658_v57 = vmul.f32 0.2, %v1654_v30  ;;  %v1655_v58 = vadd.f32 %v1914_v40, %v1645_v34 }
 0x5f2   :  { %v1662_v62 = vmax.f32 %v1654_v30, %v1658_v57  ;;  %v1659_v32 = vmul.f32 0.2, %v1655_v58 }
 0x5f4   :  { %1999 = vmatprep.mubr.f32.mxu1 %v1662_v62  ;;  %v1663_v61 = vmax.f32 %v1655_v58, %v1659_v32 }
 0x5f6   :  { %2000 = vmatmul.mubr.f32.gmra.mrb[26].mxu1 %v1663_v61 }
 0x6c1   :  { %v1998_v41 = vpop.f32.mrb[24].mxu1 }
 0x6c2   :  { %v1759_v52 = vadd.f32 %v1998_v41, %v1915_v6  ;;  %v1753_v24 = vpop.f32.mrb[25].mxu1 }
 0x6c3   :  { %v1754_v54 = vadd.f32 %v1915_v6, %v1753_v24 }
 0x6c4   :  { %1773 = vst [vmem:[#allocation20 + $0x8] sm:$0xff] %v1759_v52 }
 0x6c5   :  { %1772 = vst [vmem:[#allocation20] sm:$0xff] %v1754_v54 }
 0x6c9   :  { %v2001_v44 = vpop.f32.mrb[26].mxu1 }
 0x6ca   :  { %v1769_v48 = vadd.f32 %v2001_v44, %v1915_v6  ;;  %v1763_v11 = vpop.f32.mrb[27].mxu1 }
 0x6cb   :  { %v1764_v8 = vadd.f32 %v1915_v6, %v1763_v11 }
 0x6cc   :  { %1775 = vst [vmem:[#allocation20 + $0x18] sm:$0xff] %v1769_v48 }
 0x6cd   :  { %1774 = vst [vmem:[#allocation20 + $0x10] sm:$0xff] %v1764_v8 }
 0x6ce   :  { %2508 = shalt.err (!%p2505_p8)
}
 0x6cf   :  { %s2509_s23 = scalar_lea.hbm %s3162_s15, 512 }
 0x6d0   :  { %p2510_p9 = scmp.ne.s32.totalorder %s3162_s15, %s2509_s23  ;;  %p2513_p10 = scmp.lt.u32.totalorder %s2509_s23, %s3162_s15 }
 0x6d2   :  { %p2515_p11 = pnand %p2513_p10, %p2510_p9 }
 0x6d4   :  { %2518 = shalt.err (!%p2515_p11)
}
 0x6d5   :  { %1787 = dma.vmem_to_hbm [thread:$0]  %s1782_s22, 512, %s3162_s15, [#allocation4], %s2545_s3, %s2545_s3, %s2546_s29  }
 0x6d6   :  { %2531 = dma.done.wait [#allocation4], 512  }
 0x6d7   :  { %2532 = vsyncadd [#allocation4], 4294966784 }
 0x6d8   :  { %1791 = vsyncpa [#allocation3], 1 }
 0x6d9   :  { %1792 = vsyncpa [#allocation6], 1 }
 0x6da   :  { %1793 = vsyncpa [#allocation9], 1 }
 0x6db   :  { %1794 = vsyncpa [#allocation12], 1 }
 0x6dc   :  { %1795 = vsyncpa [#allocation15], 1 }
 0x6dd   :  { %1796 = vsyncpa [#allocation18], 1 }
 0x6de   :  { %1797 = vsyncpa [#allocation4], 1 }

</bundles_post_ra>
